<compile_context>
chip_gen: v6e
topology: v6e:2x2x1
jax: 0.10.0
libtpu: 0.0.40
codegen_flags: <defaults>
</compile_context>

<pallas_src>
import functools

import jax
import jax.numpy as jnp
from jax.experimental import pallas as pl
from jax.experimental.pallas import tpu as pltpu

LN_EPS = 1e-5  # torch nn.LayerNorm default


def _round_up(n, m):
    return ((n + m - 1) // m) * m


def _padded_bytes(shape, dtype_bytes):
    """Bytes of a VMEM buffer after (8, 128) sublane/lane padding."""
    dims = list(shape)
    dims[-1] = _round_up(dims[-1], 128)
    if len(dims) >= 2:
        dims[-2] = _round_up(dims[-2], 8)
    n = dtype_bytes
    for d in dims:
        n *= d
    return n


def _clamp_vmem(total_bytes, *, headroom=1.5, floor=16 << 20, cap=56 << 20):
    # Floor never goes below the smallest default scoped limit (16 MiB on v5e);
    # cap keeps the budget inside v7x's 64 MiB physical VMEM with headroom.
    return int(max(floor, min(cap, total_bytes * headroom)))


def _layernorm(v, w, b):
    mu = jnp.mean(v, axis=-1, keepdims=True)
    var = jnp.mean((v - mu) ** 2, axis=-1, keepdims=True)
    return (v - mu) * jax.lax.rsqrt(var + LN_EPS) * w + b


def _gelu(x):
    # TODO(synk): torch nn.GELU defaults to the exact erf form; erf lowering in
    # Mosaic is not guaranteed, so the tanh approximation is used here.
    return jax.nn.gelu(x, approximate=True)


def _softmax_masked(s, n_valid):
    """Softmax over the last axis; key columns >= n_valid (padding) are masked."""
    if n_valid < s.shape[-1]:
        col = jax.lax.broadcasted_iota(jnp.int32, s.shape, s.ndim - 1)
        s = jnp.where(col < n_valid, s, -1e30)
    m = jnp.max(s, axis=-1, keepdims=True)
    e = jnp.exp(s - m)
    denom = jnp.sum(e, axis=-1, keepdims=True)
    # EUP reciprocal — free slot while VPU/MXU are busy.
    return e * pl.reciprocal(denom, approx=True)


# --------- patch embed:  Conv2d(k=s=patch)  ==  extracted patches @ W + b ----
def _linear_kernel(x_ref, w_ref, b_ref, o_ref):
    o_ref[...] = (
        jnp.dot(x_ref[...], w_ref[...], preferred_element_type=jnp.float32)
        + b_ref[...]
    )


def linear_tiled(x, w, b, *, block_m=512):
    """y = x @ w + b, tiled over rows so the DMA/compute pipeline is active."""
    M, K = x.shape
    N = w.shape[1]
    bm = min(block_m, M)
    vmem = _clamp_vmem(
        2 * _padded_bytes((bm, K), x.dtype.itemsize)       # input rows, 2 bufs
        + _padded_bytes((K, N), w.dtype.itemsize)          # weight, single buffer
        + _padded_bytes((1, N), 4)                         # bias, single buffer
        + 4 * _padded_bytes((bm, N), 4))                   # output (2 bufs) + temps
    return pl.pallas_call(
        _linear_kernel,
        out_shape=jax.ShapeDtypeStruct((M, N), jnp.float32),
        grid=(pl.cdiv(M, bm),),
        in_specs=[
            pl.BlockSpec((bm, K), lambda i: (i, 0)),
            # Constant-index blocks: fetched once, single-buffered.
            pl.BlockSpec((K, N), lambda i: (0, 0), pipeline_mode=pl.Buffered(1)),
            pl.BlockSpec((1, N), lambda i: (0, 0), pipeline_mode=pl.Buffered(1)),
        ],
        out_specs=pl.BlockSpec((bm, N), lambda i: (i, 0)),
        compiler_params=pltpu.CompilerParams(
            dimension_semantics=("parallel",), vmem_limit_bytes=vmem),
    )(x, w, b)


# -------------------- depth-fused encoder stack kernel -----------------------
def _vit_blocks_kernel(x_ref, ln1w_ref, ln1b_ref, wq_ref, wk_ref, wv_ref,
                       wproj_ref, bproj_ref, ln2w_ref, ln2b_ref,
                       w1_ref, b1_ref, w2_ref, b2_ref, nrmw_ref, nrmb_ref,
                       o_ref, res_ref, *, num_heads, n_valid):
    d = pl.program_id(1)

    @pl.when(d == 0)
    def _():
        # Load the (pos-embedded, padded) tokens into the resident residual.
        res_ref[...] = x_ref[0]

    x = res_ref[...]                                   # (Npad, C) f32 residual
    n, c = x.shape
    dh = c // num_heads

    # ---- pre-norm multi-head self-attention ----
    h = _layernorm(x, ln1w_ref[0], ln1b_ref[0]).astype(jnp.bfloat16)
    # Full-width (N,C)@(C,C) projections; 1/sqrt(dh) is pre-folded into w_q.
    q = jnp.dot(h, wq_ref[0], preferred_element_type=jnp.float32)
    k = jnp.dot(h, wk_ref[0], preferred_element_type=jnp.float32)
    v = jnp.dot(h, wv_ref[0], preferred_element_type=jnp.float32)

    def heads(t):
        # (N, C) -> (H, N, dh): a single retile per tensor (no per-head slices).
        return jnp.transpose(
            t.astype(jnp.bfloat16).reshape(n, num_heads, dh), (1, 0, 2))

    q3, k3, v3 = heads(q), heads(k), heads(v)

    # scores: (H, N, N) — one head-batched MXU contraction.
    s = jnp.einsum('hqd,hkd->hqk', q3, k3, preferred_element_type=jnp.float32)
    p = _softmax_masked(s, n_valid)                    # attn_drop = identity (rate 0)
    # out: (H, N, dh) — one head-batched MXU contraction.
    o3 = jnp.einsum('hqk,hkd->hqd', p.astype(jnp.bfloat16), v3,
                    preferred_element_type=jnp.float32)
    # re-merge heads: single retile back to (N, C).
    attn = jnp.transpose(o3.astype(jnp.bfloat16), (1, 0, 2)).reshape(n, c)
    attn = (jnp.dot(attn, wproj_ref[0], preferred_element_type=jnp.float32)
            + bproj_ref[0])
    x1 = x + attn                                      # residual (DropPath = identity)

    # ---- pre-norm MLP ----
    h2 = _layernorm(x1, ln2w_ref[0], ln2b_ref[0]).astype(jnp.bfloat16)
    m = jnp.dot(h2, w1_ref[0], preferred_element_type=jnp.float32) + b1_ref[0]
    m = _gelu(m).astype(jnp.bfloat16)
    m = jnp.dot(m, w2_ref[0], preferred_element_type=jnp.float32) + b2_ref[0]
    out = x1 + m
    res_ref[...] = out

    @pl.when(d == pl.num_programs(1) - 1)
    def _():
        # Final ViT LayerNorm fused into the last depth step (commutes with
        # slicing the cls token in the wrapper).
        o_ref[0] = _layernorm(out, nrmw_ref[...], nrmb_ref[...])


def encoder_stack(tokens, blk, norm_w, norm_b, *, num_heads, n_valid):
    B, Npad, C = tokens.shape
    depth, _, Hd = blk['w1'].shape
    dh = C // num_heads

    vmem = _clamp_vmem(
        2 * (4 * _padded_bytes((C, C), 2) + _padded_bytes((C, Hd), 2)
             + _padded_bytes((Hd, C), 2))                     # bf16 layer weights, 2 bufs
        + 2 * (6 * _padded_bytes((1, C), 4) + _padded_bytes((1, Hd), 4))  # LN/bias rows
        + 2 * _padded_bytes((1, C), 4)                        # final norm (1 buf)
        + 5 * _padded_bytes((Npad, C), 4)                     # token in/out (2 bufs) + residual
        + 7 * _padded_bytes((Npad, C), 4)                     # (N,C) f32 temporaries
        + 4 * num_heads * _padded_bytes((Npad, dh), 4)        # per-head q/k/v/out
        + 2 * num_heads * _padded_bytes((Npad, Npad), 4)      # scores + probs
        + 2 * _padded_bytes((Npad, Hd), 4))                   # MLP hidden

    def layer_spec(shape):
        nd = len(shape)
        return pl.BlockSpec((1,) + shape[1:],
                            lambda b, d: (d,) + (0,) * (nd - 1))

    def const_spec(shape):
        # Constant-index blocks: fetched once, single-buffered.
        return pl.BlockSpec(shape, lambda b, d: (0,) * len(shape),
                            pipeline_mode=pl.Buffered(1))

    kernel = functools.partial(_vit_blocks_kernel, num_heads=num_heads,
                               n_valid=n_valid)
    # TODO(synk): at ViT-B scale on v7x (64 MiB VMEM) consider splitting the MLP
    # into its own token-tiled pallas_call so only the attention weights stay
    # resident in this kernel.
    return pl.pallas_call(
        kernel,
        out_shape=jax.ShapeDtypeStruct((B, Npad, C), jnp.float32),
        grid=(B, depth),
        in_specs=[
            pl.BlockSpec((1, Npad, C), lambda b, d: (b, 0, 0)),
            layer_spec(blk['ln1_w'].shape), layer_spec(blk['ln1_b'].shape),
            layer_spec(blk['w_q'].shape), layer_spec(blk['w_k'].shape),
            layer_spec(blk['w_v'].shape),
            layer_spec(blk['w_proj'].shape), layer_spec(blk['b_proj'].shape),
            layer_spec(blk['ln2_w'].shape), layer_spec(blk['ln2_b'].shape),
            layer_spec(blk['w1'].shape), layer_spec(blk['b1'].shape),
            layer_spec(blk['w2'].shape), layer_spec(blk['b2'].shape),
            const_spec(norm_w.shape), const_spec(norm_b.shape),
        ],
        out_specs=pl.BlockSpec((1, Npad, C), lambda b, d: (b, 0, 0)),
        scratch_shapes=[pltpu.VMEM((Npad, C), jnp.float32)],   # resident residual
        compiler_params=pltpu.CompilerParams(
            dimension_semantics=("parallel", "arbitrary"),
            vmem_limit_bytes=vmem),
    )(tokens, blk['ln1_w'], blk['ln1_b'], blk['w_q'], blk['w_k'], blk['w_v'],
      blk['w_proj'], blk['b_proj'], blk['ln2_w'], blk['ln2_b'],
      blk['w1'], blk['b1'], blk['w2'], blk['b2'], norm_w, norm_b)


# ------------------------------ glue / params --------------------------------
def extract_patches(x, p):
    # NCHW -> (B, num_patches, C*p*p), patch vector ordered (c, kh, kw) to match
    # the flattened Conv2d weight layout (E, C, p, p).
    B, C, H, W = x.shape
    gh, gw = H // p, W // p
    x = x.reshape(B, C, gh, p, gw, p)
    x = x.transpose(0, 2, 4, 1, 3, 5)
    return x.reshape(B, gh * gw, C * p * p)


def init_params(key, *, in_dim, patch_size, embed_dim, depth, num_heads,
                mlp_ratio, num_patches):
    def tn(k, shape, std=0.02):
        return jax.random.truncated_normal(k, -2.0, 2.0, shape, jnp.float32) * std

    keys = jax.random.split(key, 3 + depth)
    C = embed_dim
    Hd = int(C * mlp_ratio)
    K = in_dim * patch_size * patch_size
    dh = C // num_heads
    scale = float(dh) ** -0.5

    params = {
        'patch_w': tn(keys[0], (K, C)).astype(jnp.bfloat16),  # Conv2d proj, flattened
        'patch_b': jnp.zeros((1, C), jnp.float32),
        'cls_token': tn(keys[1], (1, 1, C)),
        'pos_embed': tn(keys[2], (1, num_patches + 1, C)),
        'norm_w': jnp.ones((1, C), jnp.float32),
        'norm_b': jnp.zeros((1, C), jnp.float32),
    }
    blk_keys = [jax.random.split(keys[3 + i], 4) for i in range(depth)]
    wqkv = jnp.stack([tn(bk[0], (C, 3 * C)) for bk in blk_keys])  # qkv_bias=False
    params['blocks'] = {
        'ln1_w': jnp.ones((depth, 1, C), jnp.float32),
        'ln1_b': jnp.zeros((depth, 1, C), jnp.float32),
        # 1/sqrt(head_dim) folded into the Q weight (exact: no q bias).
        'w_q': (wqkv[:, :, 0:C] * scale).astype(jnp.bfloat16),
        'w_k': wqkv[:, :, C:2 * C].astype(jnp.bfloat16),
        'w_v': wqkv[:, :, 2 * C:3 * C].astype(jnp.bfloat16),
        'w_proj': jnp.stack([tn(bk[1], (C, C)) for bk in blk_keys]).astype(jnp.bfloat16),
        'b_proj': jnp.zeros((depth, 1, C), jnp.float32),
        'ln2_w': jnp.ones((depth, 1, C), jnp.float32),
        'ln2_b': jnp.zeros((depth, 1, C), jnp.float32),
        'w1': jnp.stack([tn(bk[2], (C, Hd)) for bk in blk_keys]).astype(jnp.bfloat16),
        'b1': jnp.zeros((depth, 1, Hd), jnp.float32),
        'w2': jnp.stack([tn(bk[3], (Hd, C)) for bk in blk_keys]).astype(jnp.bfloat16),
        'b2': jnp.zeros((depth, 1, C), jnp.float32),
    }
    return params


def vit_forward(x, params, *, num_heads, patch_size):
    B = x.shape[0]
    patches = extract_patches(x, patch_size)               # (B, P, K)
    P, K = patches.shape[1], patches.shape[2]
    E = params['patch_w'].shape[1]

    emb = linear_tiled(patches.reshape(B * P, K).astype(jnp.bfloat16),
                       params['patch_w'], params['patch_b'])
    emb = emb.reshape(B, P, E)                              # PatchEmbed output

    cls = jnp.broadcast_to(params['cls_token'], (B, 1, E))
    tokens = jnp.concatenate([cls, emb], axis=1)            # (B, P+1, E)
    tokens = tokens + params['pos_embed']                   # same-res pos encoding
    # pos_drop / attn_drop / proj_drop / DropPath: rate 0.0 -> identity.

    # Pad token count to a sublane/bf16-friendly multiple; pad keys are masked
    # in-kernel so they never influence valid tokens.
    N = P + 1
    Npad = _round_up(N, 16)
    # TODO(synk): on v6e/v7x benchmark Npad rounded to 128 (lane-dense scores /
    # softmax) if the VPU path shows up as the binding slot.
    if Npad != N:
        tokens = jnp.pad(tokens, ((0, 0), (0, Npad - N), (0, 0)))

    tokens = encoder_stack(tokens, params['blocks'], params['norm_w'],
                           params['norm_b'], num_heads=num_heads, n_valid=N)

    # Final LayerNorm is already applied inside the last depth step.
    return tokens[:, 0, :]                                  # (B, E)
    # self.head is never applied in the reference forward (returns x[:, 0]).


if __name__ == "__main__":
    # small ViT config
    img_size, patch_size, in_dim = 16, 4, 3
    embed_dim, depth, num_heads, mlp_ratio = 32, 2, 4, 4
    num_patches = (img_size // patch_size) ** 2             # 16
    B = 2

    key = jax.random.PRNGKey(0)
    k_param, k_x = jax.random.split(key)
    params = init_params(k_param, in_dim=in_dim, patch_size=patch_size,
                         embed_dim=embed_dim, depth=depth, num_heads=num_heads,
                         mlp_ratio=mlp_ratio, num_patches=num_patches)
    x = jax.random.normal(k_x, (B, in_dim, img_size, img_size), jnp.float32)

    fwd = jax.jit(functools.partial(vit_forward, num_heads=num_heads,
                                    patch_size=patch_size))
    out = jax.block_until_ready(fwd(x, params))

    assert out.shape == (B, embed_dim), out.shape
    assert bool(jnp.all(jnp.isfinite(out)))
    print("KERNEL_OK")
</pallas_src>

<mosaic_0001>
module attributes {stable_mosaic.version = 11 : i64} {
  func.func @_vit_blocks_kernel(%arg0: i32, %arg1: i32, %arg2: memref<1x32x32xf32, #tpu.memory_space<vmem>>, %arg3: memref<1x1x32xf32, #tpu.memory_space<vmem>>, %arg4: memref<1x1x32xf32, #tpu.memory_space<vmem>>, %arg5: memref<1x32x32xbf16, #tpu.memory_space<vmem>>, %arg6: memref<1x32x32xbf16, #tpu.memory_space<vmem>>, %arg7: memref<1x32x32xbf16, #tpu.memory_space<vmem>>, %arg8: memref<1x32x32xbf16, #tpu.memory_space<vmem>>, %arg9: memref<1x1x32xf32, #tpu.memory_space<vmem>>, %arg10: memref<1x1x32xf32, #tpu.memory_space<vmem>>, %arg11: memref<1x1x32xf32, #tpu.memory_space<vmem>>, %arg12: memref<1x32x128xbf16, #tpu.memory_space<vmem>>, %arg13: memref<1x1x128xf32, #tpu.memory_space<vmem>>, %arg14: memref<1x128x32xbf16, #tpu.memory_space<vmem>>, %arg15: memref<1x1x32xf32, #tpu.memory_space<vmem>>, %arg16: memref<1x32xf32, #tpu.memory_space<vmem>>, %arg17: memref<1x32xf32, #tpu.memory_space<vmem>>, %arg18: memref<1x32x32xf32, #tpu.memory_space<vmem>>, %arg19: memref<32x32xf32, #tpu.memory_space<vmem>>) attributes {dimension_semantics = [#tpu.dimension_semantics<parallel>, #tpu.dimension_semantics<arbitrary>], iteration_bounds = array<i64: 2, 2>, scalar_prefetch = 0 : i64, scratch_operands = 1 : i64, tpu.core_type = #tpu.core_type<tc>, window_params = [{transform_indices = @transform_0, window_bounds = array<i64: 1, 32, 32>}, {transform_indices = @transform_1, window_bounds = array<i64: 1, 1, 32>}, {transform_indices = @transform_2, window_bounds = array<i64: 1, 1, 32>}, {transform_indices = @transform_3, window_bounds = array<i64: 1, 32, 32>}, {transform_indices = @transform_4, window_bounds = array<i64: 1, 32, 32>}, {transform_indices = @transform_5, window_bounds = array<i64: 1, 32, 32>}, {transform_indices = @transform_6, window_bounds = array<i64: 1, 32, 32>}, {transform_indices = @transform_7, window_bounds = array<i64: 1, 1, 32>}, {transform_indices = @transform_8, window_bounds = array<i64: 1, 1, 32>}, {transform_indices = @transform_9, window_bounds = array<i64: 1, 1, 32>}, {transform_indices = @transform_10, window_bounds = array<i64: 1, 32, 128>}, {transform_indices = @transform_11, window_bounds = array<i64: 1, 1, 128>}, {transform_indices = @transform_12, window_bounds = array<i64: 1, 128, 32>}, {transform_indices = @transform_13, window_bounds = array<i64: 1, 1, 32>}, {pipeline_mode = #tpu.pipeline_mode<synchronous>, transform_indices = @transform_14, window_bounds = array<i64: 1, 32>}, {pipeline_mode = #tpu.pipeline_mode<synchronous>, transform_indices = @transform_15, window_bounds = array<i64: 1, 32>}, {transform_indices = @transform_16, window_bounds = array<i64: 1, 32, 32>}]} {
    %c0_i32 = arith.constant 0 : i32
    %0 = arith.cmpi eq, %arg1, %c0_i32 : i32
    %1 = arith.extui %0 : i1 to i32
    %c0_i32_0 = arith.constant 0 : i32
    %2 = arith.cmpi ne, %1, %c0_i32_0 : i32
    scf.if %2 {
      %c0_68 = arith.constant 0 : index
      %c0_69 = arith.constant 0 : index
      %c0_70 = arith.constant 0 : index
      %138 = vector.load %arg2[%c0_68, %c0_69, %c0_70] : memref<1x32x32xf32, #tpu.memory_space<vmem>>, vector<1x32x32xf32>
      %139 = vector.shape_cast %138 : vector<1x32x32xf32> to vector<32x32xf32>
      %c0_71 = arith.constant 0 : index
      %c0_72 = arith.constant 0 : index
      %140 = vector.load %arg19[%c0_71, %c0_72] : memref<32x32xf32, #tpu.memory_space<vmem>>, vector<32x32xf32>
      tpu.vector_store %arg19[%c0_71, %c0_72], %139 {strides = array<i32>} : memref<32x32xf32, #tpu.memory_space<vmem>>, vector<32x32xf32>,
    } else {
    }
    %c0 = arith.constant 0 : index
    %c0_1 = arith.constant 0 : index
    %3 = vector.load %arg19[%c0, %c0_1] : memref<32x32xf32, #tpu.memory_space<vmem>>, vector<32x32xf32>
    %c0_2 = arith.constant 0 : index
    %c0_3 = arith.constant 0 : index
    %c0_4 = arith.constant 0 : index
    %4 = vector.load %arg3[%c0_2, %c0_3, %c0_4] : memref<1x1x32xf32, #tpu.memory_space<vmem>>, vector<1x1x32xf32>
    %5 = vector.shape_cast %4 : vector<1x1x32xf32> to vector<1x32xf32>
    %c0_5 = arith.constant 0 : index
    %c0_6 = arith.constant 0 : index
    %c0_7 = arith.constant 0 : index
    %6 = vector.load %arg4[%c0_5, %c0_6, %c0_7] : memref<1x1x32xf32, #tpu.memory_space<vmem>>, vector<1x1x32xf32>
    %7 = vector.shape_cast %6 : vector<1x1x32xf32> to vector<1x32xf32>
    %cst = arith.constant dense<0.000000e+00> : vector<32xf32>
    %8 = vector.multi_reduction <add>, %3, %cst [1] : vector<32x32xf32> to vector<32xf32>
    %9 = vector.shape_cast %8 : vector<32xf32> to vector<32x1xf32>
    %cst_8 = arith.constant 3.200000e+01 : f32
    %10 = vector.broadcast %cst_8 : f32 to vector<32x1xf32>
    %11 = arith.divf %9, %10 : vector<32x1xf32>
    %12 = vector.broadcast %11 : vector<32x1xf32> to vector<32x32xf32>
    %13 = arith.subf %3, %12 : vector<32x32xf32>
    %14 = arith.mulf %13, %13 : vector<32x32xf32>
    %cst_9 = arith.constant dense<0.000000e+00> : vector<32xf32>
    %15 = vector.multi_reduction <add>, %14, %cst_9 [1] : vector<32x32xf32> to vector<32xf32>
    %16 = vector.shape_cast %15 : vector<32xf32> to vector<32x1xf32>
    %cst_10 = arith.constant 3.200000e+01 : f32
    %17 = vector.broadcast %cst_10 : f32 to vector<32x1xf32>
    %18 = arith.divf %16, %17 : vector<32x1xf32>
    %19 = vector.broadcast %11 : vector<32x1xf32> to vector<32x32xf32>
    %20 = arith.subf %3, %19 : vector<32x32xf32>
    %cst_11 = arith.constant 9.99999974E-6 : f32
    %21 = vector.broadcast %cst_11 : f32 to vector<32x1xf32>
    %22 = arith.addf %18, %21 : vector<32x1xf32>
    %23 = math.rsqrt %22 : vector<32x1xf32>
    %24 = vector.broadcast %23 : vector<32x1xf32> to vector<32x32xf32>
    %25 = arith.mulf %20, %24 : vector<32x32xf32>
    %26 = vector.broadcast %5 : vector<1x32xf32> to vector<32x32xf32>
    %27 = arith.mulf %25, %26 : vector<32x32xf32>
    %28 = vector.broadcast %7 : vector<1x32xf32> to vector<32x32xf32>
    %29 = arith.addf %27, %28 : vector<32x32xf32>
    %30 = arith.truncf %29 : vector<32x32xf32> to vector<32x32xbf16>
    %c0_12 = arith.constant 0 : index
    %c0_13 = arith.constant 0 : index
    %c0_14 = arith.constant 0 : index
    %31 = vector.load %arg5[%c0_12, %c0_13, %c0_14] : memref<1x32x32xbf16, #tpu.memory_space<vmem>>, vector<1x32x32xbf16>
    %32 = vector.shape_cast %31 : vector<1x32x32xbf16> to vector<32x32xbf16>
    %cst_15 = arith.constant dense<0.000000e+00> : vector<32x32xf32>
    %33 = tpu.matmul %30, %32, %cst_15 {dimension_numbers = #tpu.dot_dimension_numbers<[1], [0], [0], [1], [0, 0, 1, 1], [], []>} : vector<32x32xbf16>, vector<32x32xbf16>, vector<32x32xf32> -> vector<32x32xf32>
    %c0_16 = arith.constant 0 : index
    %c0_17 = arith.constant 0 : index
    %c0_18 = arith.constant 0 : index
    %34 = vector.load %arg6[%c0_16, %c0_17, %c0_18] : memref<1x32x32xbf16, #tpu.memory_space<vmem>>, vector<1x32x32xbf16>
    %35 = vector.shape_cast %34 : vector<1x32x32xbf16> to vector<32x32xbf16>
    %cst_19 = arith.constant dense<0.000000e+00> : vector<32x32xf32>
    %36 = tpu.matmul %30, %35, %cst_19 {dimension_numbers = #tpu.dot_dimension_numbers<[1], [0], [0], [1], [0, 0, 1, 1], [], []>} : vector<32x32xbf16>, vector<32x32xbf16>, vector<32x32xf32> -> vector<32x32xf32>
    %c0_20 = arith.constant 0 : index
    %c0_21 = arith.constant 0 : index
    %c0_22 = arith.constant 0 : index
    %37 = vector.load %arg7[%c0_20, %c0_21, %c0_22] : memref<1x32x32xbf16, #tpu.memory_space<vmem>>, vector<1x32x32xbf16>
    %38 = vector.shape_cast %37 : vector<1x32x32xbf16> to vector<32x32xbf16>
    %cst_23 = arith.constant dense<0.000000e+00> : vector<32x32xf32>
    %39 = tpu.matmul %30, %38, %cst_23 {dimension_numbers = #tpu.dot_dimension_numbers<[1], [0], [0], [1], [0, 0, 1, 1], [], []>} : vector<32x32xbf16>, vector<32x32xbf16>, vector<32x32xf32> -> vector<32x32xf32>
    %40 = arith.truncf %33 : vector<32x32xf32> to vector<32x32xbf16>
    %41 = vector.shape_cast %40 : vector<32x32xbf16> to vector<32x4x8xbf16>
    %42 = tpu.transpose %41, [1, 0, 2] : vector<32x4x8xbf16> -> vector<4x32x8xbf16>
    %43 = arith.truncf %36 : vector<32x32xf32> to vector<32x32xbf16>
    %44 = vector.shape_cast %43 : vector<32x32xbf16> to vector<32x4x8xbf16>
    %45 = tpu.transpose %44, [1, 0, 2] : vector<32x4x8xbf16> -> vector<4x32x8xbf16>
    %46 = arith.truncf %39 : vector<32x32xf32> to vector<32x32xbf16>
    %47 = vector.shape_cast %46 : vector<32x32xbf16> to vector<32x4x8xbf16>
    %48 = tpu.transpose %47, [1, 0, 2] : vector<32x4x8xbf16> -> vector<4x32x8xbf16>
    "tpu.trace_start"() <{level = 10 : i32, message = "hqd,hkd->hqk"}> : () -> ()
    %cst_24 = arith.constant dense<0.000000e+00> : vector<4x32x32xf32>
    %49 = tpu.matmul %42, %45, %cst_24 {dimension_numbers = #tpu.dot_dimension_numbers<[2], [2], [1], [1], [0, 0, 0, 1, 1, 1], [0], [0]>} : vector<4x32x8xbf16>, vector<4x32x8xbf16>, vector<4x32x32xf32> -> vector<4x32x32xf32>
    "tpu.trace_stop"() : () -> ()
    %50 = tpu.iota {dimensions = array<i32: 2>} : vector<4x32x32xi32>
    %c17_i32 = arith.constant 17 : i32
    %51 = vector.broadcast %c17_i32 : i32 to vector<4x32x32xi32>
    %52 = arith.cmpi slt, %50, %51 : vector<4x32x32xi32>
    %cst_25 = arith.constant -1.000000e+30 : f32
    %53 = vector.broadcast %cst_25 : f32 to vector<4x32x32xf32>
    %54 = arith.select %52, %49, %53 : vector<4x32x32xi1>, vector<4x32x32xf32>
    %cst_26 = arith.constant dense<0xFF800000> : vector<4x32xf32>
    %55 = vector.multi_reduction <maximumf>, %54, %cst_26 [2] : vector<4x32x32xf32> to vector<4x32xf32>
    %56 = vector.shape_cast %55 : vector<4x32xf32> to vector<4x32x1xf32>
    %57 = vector.broadcast %56 : vector<4x32x1xf32> to vector<4x32x32xf32>
    %58 = arith.subf %54, %57 : vector<4x32x32xf32>
    %59 = math.exp %58 : vector<4x32x32xf32>
    %cst_27 = arith.constant dense<0.000000e+00> : vector<4x32xf32>
    %60 = vector.multi_reduction <add>, %59, %cst_27 [2] : vector<4x32x32xf32> to vector<4x32xf32>
    %61 = vector.shape_cast %60 : vector<4x32xf32> to vector<4x32x1xf32>
    %62 = tpu.reciprocal %61 {approx = true} : vector<4x32x1xf32> -> vector<4x32x1xf32>
    %63 = vector.broadcast %62 : vector<4x32x1xf32> to vector<4x32x32xf32>
    %64 = arith.mulf %59, %63 : vector<4x32x32xf32>
    %65 = arith.truncf %64 : vector<4x32x32xf32> to vector<4x32x32xbf16>
    "tpu.trace_start"() <{level = 10 : i32, message = "hqk,hkd->hqd"}> : () -> ()
    %cst_28 = arith.constant dense<0.000000e+00> : vector<4x32x8xf32>
    %66 = tpu.matmul %65, %48, %cst_28 {dimension_numbers = #tpu.dot_dimension_numbers<[2], [1], [1], [2], [0, 0, 0, 1, 1, 2], [0], [0]>} : vector<4x32x32xbf16>, vector<4x32x8xbf16>, vector<4x32x8xf32> -> vector<4x32x8xf32>
    "tpu.trace_stop"() : () -> ()
    %67 = arith.truncf %66 : vector<4x32x8xf32> to vector<4x32x8xbf16>
    %68 = tpu.transpose %67, [1, 0, 2] : vector<4x32x8xbf16> -> vector<32x4x8xbf16>
    %69 = vector.shape_cast %68 : vector<32x4x8xbf16> to vector<32x32xbf16>
    %c0_29 = arith.constant 0 : index
    %c0_30 = arith.constant 0 : index
    %c0_31 = arith.constant 0 : index
    %70 = vector.load %arg8[%c0_29, %c0_30, %c0_31] : memref<1x32x32xbf16, #tpu.memory_space<vmem>>, vector<1x32x32xbf16>
    %71 = vector.shape_cast %70 : vector<1x32x32xbf16> to vector<32x32xbf16>
    %cst_32 = arith.constant dense<0.000000e+00> : vector<32x32xf32>
    %72 = tpu.matmul %69, %71, %cst_32 {dimension_numbers = #tpu.dot_dimension_numbers<[1], [0], [0], [1], [0, 0, 1, 1], [], []>} : vector<32x32xbf16>, vector<32x32xbf16>, vector<32x32xf32> -> vector<32x32xf32>
    %c0_33 = arith.constant 0 : index
    %c0_34 = arith.constant 0 : index
    %c0_35 = arith.constant 0 : index
    %73 = vector.load %arg9[%c0_33, %c0_34, %c0_35] : memref<1x1x32xf32, #tpu.memory_space<vmem>>, vector<1x1x32xf32>
    %74 = vector.shape_cast %73 : vector<1x1x32xf32> to vector<1x32xf32>
    %75 = vector.broadcast %74 : vector<1x32xf32> to vector<32x32xf32>
    %76 = arith.addf %72, %75 : vector<32x32xf32>
    %77 = arith.addf %3, %76 : vector<32x32xf32>
    %c0_36 = arith.constant 0 : index
    %c0_37 = arith.constant 0 : index
    %c0_38 = arith.constant 0 : index
    %78 = vector.load %arg10[%c0_36, %c0_37, %c0_38] : memref<1x1x32xf32, #tpu.memory_space<vmem>>, vector<1x1x32xf32>
    %79 = vector.shape_cast %78 : vector<1x1x32xf32> to vector<1x32xf32>
    %c0_39 = arith.constant 0 : index
    %c0_40 = arith.constant 0 : index
    %c0_41 = arith.constant 0 : index
    %80 = vector.load %arg11[%c0_39, %c0_40, %c0_41] : memref<1x1x32xf32, #tpu.memory_space<vmem>>, vector<1x1x32xf32>
    %81 = vector.shape_cast %80 : vector<1x1x32xf32> to vector<1x32xf32>
    %cst_42 = arith.constant dense<0.000000e+00> : vector<32xf32>
    %82 = vector.multi_reduction <add>, %77, %cst_42 [1] : vector<32x32xf32> to vector<32xf32>
    %83 = vector.shape_cast %82 : vector<32xf32> to vector<32x1xf32>
    %cst_43 = arith.constant 3.200000e+01 : f32
    %84 = vector.broadcast %cst_43 : f32 to vector<32x1xf32>
    %85 = arith.divf %83, %84 : vector<32x1xf32>
    %86 = vector.broadcast %85 : vector<32x1xf32> to vector<32x32xf32>
    %87 = arith.subf %77, %86 : vector<32x32xf32>
    %88 = arith.mulf %87, %87 : vector<32x32xf32>
    %cst_44 = arith.constant dense<0.000000e+00> : vector<32xf32>
    %89 = vector.multi_reduction <add>, %88, %cst_44 [1] : vector<32x32xf32> to vector<32xf32>
    %90 = vector.shape_cast %89 : vector<32xf32> to vector<32x1xf32>
    %cst_45 = arith.constant 3.200000e+01 : f32
    %91 = vector.broadcast %cst_45 : f32 to vector<32x1xf32>
    %92 = arith.divf %90, %91 : vector<32x1xf32>
    %93 = vector.broadcast %85 : vector<32x1xf32> to vector<32x32xf32>
    %94 = arith.subf %77, %93 : vector<32x32xf32>
    %cst_46 = arith.constant 9.99999974E-6 : f32
    %95 = vector.broadcast %cst_46 : f32 to vector<32x1xf32>
    %96 = arith.addf %92, %95 : vector<32x1xf32>
    %97 = math.rsqrt %96 : vector<32x1xf32>
    %98 = vector.broadcast %97 : vector<32x1xf32> to vector<32x32xf32>
    %99 = arith.mulf %94, %98 : vector<32x32xf32>
    %100 = vector.broadcast %79 : vector<1x32xf32> to vector<32x32xf32>
    %101 = arith.mulf %99, %100 : vector<32x32xf32>
    %102 = vector.broadcast %81 : vector<1x32xf32> to vector<32x32xf32>
    %103 = arith.addf %101, %102 : vector<32x32xf32>
    %104 = arith.truncf %103 : vector<32x32xf32> to vector<32x32xbf16>
    %c0_47 = arith.constant 0 : index
    %c0_48 = arith.constant 0 : index
    %c0_49 = arith.constant 0 : index
    %105 = vector.load %arg12[%c0_47, %c0_48, %c0_49] : memref<1x32x128xbf16, #tpu.memory_space<vmem>>, vector<1x32x128xbf16>
    %106 = vector.shape_cast %105 : vector<1x32x128xbf16> to vector<32x128xbf16>
    %cst_50 = arith.constant dense<0.000000e+00> : vector<32x128xf32>
    %107 = tpu.matmul %104, %106, %cst_50 {dimension_numbers = #tpu.dot_dimension_numbers<[1], [0], [0], [1], [0, 0, 1, 1], [], []>} : vector<32x32xbf16>, vector<32x128xbf16>, vector<32x128xf32> -> vector<32x128xf32>
    %c0_51 = arith.constant 0 : index
    %c0_52 = arith.constant 0 : index
    %c0_53 = arith.constant 0 : index
    %108 = vector.load %arg13[%c0_51, %c0_52, %c0_53] : memref<1x1x128xf32, #tpu.memory_space<vmem>>, vector<1x1x128xf32>
    %109 = vector.shape_cast %108 : vector<1x1x128xf32> to vector<1x128xf32>
    %110 = vector.broadcast %109 : vector<1x128xf32> to vector<32x128xf32>
    %111 = arith.addf %107, %110 : vector<32x128xf32>
    %112 = arith.mulf %111, %111 : vector<32x128xf32>
    %113 = arith.mulf %111, %112 : vector<32x128xf32>
    %cst_54 = arith.constant 4.471500e-02 : f32
    %114 = vector.broadcast %cst_54 : f32 to vector<32x128xf32>
    %115 = arith.mulf %114, %113 : vector<32x128xf32>
    %116 = arith.addf %111, %115 : vector<32x128xf32>
    %cst_55 = arith.constant 0.797884583 : f32
    %117 = vector.broadcast %cst_55 : f32 to vector<32x128xf32>
    %118 = arith.mulf %117, %116 : vector<32x128xf32>
    %119 = math.tanh %118 : vector<32x128xf32>
    %cst_56 = arith.constant 1.000000e+00 : f32
    %120 = vector.broadcast %cst_56 : f32 to vector<32x128xf32>
    %121 = arith.addf %120, %119 : vector<32x128xf32>
    %cst_57 = arith.constant 5.000000e-01 : f32
    %122 = vector.broadcast %cst_57 : f32 to vector<32x128xf32>
    %123 = arith.mulf %122, %121 : vector<32x128xf32>
    %124 = arith.mulf %111, %123 : vector<32x128xf32>
    %125 = arith.truncf %124 : vector<32x128xf32> to vector<32x128xbf16>
    %c0_58 = arith.constant 0 : index
    %c0_59 = arith.constant 0 : index
    %c0_60 = arith.constant 0 : index
    %126 = vector.load %arg14[%c0_58, %c0_59, %c0_60] : memref<1x128x32xbf16, #tpu.memory_space<vmem>>, vector<1x128x32xbf16>
    %127 = vector.shape_cast %126 : vector<1x128x32xbf16> to vector<128x32xbf16>
    %cst_61 = arith.constant dense<0.000000e+00> : vector<32x32xf32>
    %128 = tpu.matmul %125, %127, %cst_61 {dimension_numbers = #tpu.dot_dimension_numbers<[1], [0], [0], [1], [0, 0, 1, 1], [], []>} : vector<32x128xbf16>, vector<128x32xbf16>, vector<32x32xf32> -> vector<32x32xf32>
    %c0_62 = arith.constant 0 : index
    %c0_63 = arith.constant 0 : index
    %c0_64 = arith.constant 0 : index
    %129 = vector.load %arg15[%c0_62, %c0_63, %c0_64] : memref<1x1x32xf32, #tpu.memory_space<vmem>>, vector<1x1x32xf32>
    %130 = vector.shape_cast %129 : vector<1x1x32xf32> to vector<1x32xf32>
    %131 = vector.broadcast %130 : vector<1x32xf32> to vector<32x32xf32>
    %132 = arith.addf %128, %131 : vector<32x32xf32>
    %133 = arith.addf %77, %132 : vector<32x32xf32>
    %c0_65 = arith.constant 0 : index
    %c0_66 = arith.constant 0 : index
    %134 = vector.load %arg19[%c0_65, %c0_66] : memref<32x32xf32, #tpu.memory_space<vmem>>, vector<32x32xf32>
    tpu.vector_store %arg19[%c0_65, %c0_66], %133 {strides = array<i32>} : memref<32x32xf32, #tpu.memory_space<vmem>>, vector<32x32xf32>,
    %c1_i32 = arith.constant 1 : i32
    %135 = arith.cmpi eq, %arg1, %c1_i32 : i32
    %136 = arith.extui %135 : i1 to i32
    %c0_i32_67 = arith.constant 0 : i32
    %137 = arith.cmpi ne, %136, %c0_i32_67 : i32
    scf.if %137 {
      %c0_68 = arith.constant 0 : index
      %c0_69 = arith.constant 0 : index
      %138 = vector.load %arg16[%c0_68, %c0_69] : memref<1x32xf32, #tpu.memory_space<vmem>>, vector<1x32xf32>
      %c0_70 = arith.constant 0 : index
      %c0_71 = arith.constant 0 : index
      %139 = vector.load %arg17[%c0_70, %c0_71] : memref<1x32xf32, #tpu.memory_space<vmem>>, vector<1x32xf32>
      %cst_72 = arith.constant dense<0.000000e+00> : vector<32xf32>
      %140 = vector.multi_reduction <add>, %133, %cst_72 [1] : vector<32x32xf32> to vector<32xf32>
      %141 = vector.shape_cast %140 : vector<32xf32> to vector<32x1xf32>
      %cst_73 = arith.constant 3.200000e+01 : f32
      %142 = vector.broadcast %cst_73 : f32 to vector<32x1xf32>
      %143 = arith.divf %141, %142 : vector<32x1xf32>
      %144 = vector.broadcast %143 : vector<32x1xf32> to vector<32x32xf32>
      %145 = arith.subf %133, %144 : vector<32x32xf32>
      %146 = arith.mulf %145, %145 : vector<32x32xf32>
      %cst_74 = arith.constant dense<0.000000e+00> : vector<32xf32>
      %147 = vector.multi_reduction <add>, %146, %cst_74 [1] : vector<32x32xf32> to vector<32xf32>
      %148 = vector.shape_cast %147 : vector<32xf32> to vector<32x1xf32>
      %cst_75 = arith.constant 3.200000e+01 : f32
      %149 = vector.broadcast %cst_75 : f32 to vector<32x1xf32>
      %150 = arith.divf %148, %149 : vector<32x1xf32>
      %151 = vector.broadcast %143 : vector<32x1xf32> to vector<32x32xf32>
      %152 = arith.subf %133, %151 : vector<32x32xf32>
      %cst_76 = arith.constant 9.99999974E-6 : f32
      %153 = vector.broadcast %cst_76 : f32 to vector<32x1xf32>
      %154 = arith.addf %150, %153 : vector<32x1xf32>
      %155 = math.rsqrt %154 : vector<32x1xf32>
      %156 = vector.broadcast %155 : vector<32x1xf32> to vector<32x32xf32>
      %157 = arith.mulf %152, %156 : vector<32x32xf32>
      %158 = vector.broadcast %138 : vector<1x32xf32> to vector<32x32xf32>
      %159 = arith.mulf %157, %158 : vector<32x32xf32>
      %160 = vector.broadcast %139 : vector<1x32xf32> to vector<32x32xf32>
      %161 = arith.addf %159, %160 : vector<32x32xf32>
      %c0_77 = arith.constant 0 : index
      %c0_78 = arith.constant 0 : index
      %c0_79 = arith.constant 0 : index
      %162 = vector.load %arg18[%c0_77, %c0_78, %c0_79] : memref<1x32x32xf32, #tpu.memory_space<vmem>>, vector<1x32x32xf32>
      %163 = vector.shape_cast %162 : vector<1x32x32xf32> to vector<32x32xf32>
      %164 = vector.shape_cast %161 : vector<32x32xf32> to vector<1x32x32xf32>
      tpu.vector_store %arg18[%c0_77, %c0_78, %c0_79], %164 {strides = array<i32>} : memref<1x32x32xf32, #tpu.memory_space<vmem>>, vector<1x32x32xf32>,
    } else {
    }
    return
  }
  func.func @transform_0(%arg0: i32, %arg1: i32) -> (i32, i32, i32) {
    %c0_i32 = arith.constant 0 : i32
    %c0_i32_0 = arith.constant 0 : i32
    %c0_i32_1 = arith.constant 0 : i32
    return %arg0, %c0_i32, %c0_i32_0 : i32, i32, i32
  }
  func.func @transform_1(%arg0: i32, %arg1: i32) -> (i32, i32, i32) {
    %c0_i32 = arith.constant 0 : i32
    %c0_i32_0 = arith.constant 0 : i32
    %c0_i32_1 = arith.constant 0 : i32
    return %arg1, %c0_i32, %c0_i32_0 : i32, i32, i32
  }
  func.func @transform_2(%arg0: i32, %arg1: i32) -> (i32, i32, i32) {
    %c0_i32 = arith.constant 0 : i32
    %c0_i32_0 = arith.constant 0 : i32
    %c0_i32_1 = arith.constant 0 : i32
    return %arg1, %c0_i32, %c0_i32_0 : i32, i32, i32
  }
  func.func @transform_3(%arg0: i32, %arg1: i32) -> (i32, i32, i32) {
    %c0_i32 = arith.constant 0 : i32
    %c0_i32_0 = arith.constant 0 : i32
    %c0_i32_1 = arith.constant 0 : i32
    return %arg1, %c0_i32, %c0_i32_0 : i32, i32, i32
  }
  func.func @transform_4(%arg0: i32, %arg1: i32) -> (i32, i32, i32) {
    %c0_i32 = arith.constant 0 : i32
    %c0_i32_0 = arith.constant 0 : i32
    %c0_i32_1 = arith.constant 0 : i32
    return %arg1, %c0_i32, %c0_i32_0 : i32, i32, i32
  }
  func.func @transform_5(%arg0: i32, %arg1: i32) -> (i32, i32, i32) {
    %c0_i32 = arith.constant 0 : i32
    %c0_i32_0 = arith.constant 0 : i32
    %c0_i32_1 = arith.constant 0 : i32
    return %arg1, %c0_i32, %c0_i32_0 : i32, i32, i32
  }
  func.func @transform_6(%arg0: i32, %arg1: i32) -> (i32, i32, i32) {
    %c0_i32 = arith.constant 0 : i32
    %c0_i32_0 = arith.constant 0 : i32
    %c0_i32_1 = arith.constant 0 : i32
    return %arg1, %c0_i32, %c0_i32_0 : i32, i32, i32
  }
  func.func @transform_7(%arg0: i32, %arg1: i32) -> (i32, i32, i32) {
    %c0_i32 = arith.constant 0 : i32
    %c0_i32_0 = arith.constant 0 : i32
    %c0_i32_1 = arith.constant 0 : i32
    return %arg1, %c0_i32, %c0_i32_0 : i32, i32, i32
  }
  func.func @transform_8(%arg0: i32, %arg1: i32) -> (i32, i32, i32) {
    %c0_i32 = arith.constant 0 : i32
    %c0_i32_0 = arith.constant 0 : i32
    %c0_i32_1 = arith.constant 0 : i32
    return %arg1, %c0_i32, %c0_i32_0 : i32, i32, i32
  }
  func.func @transform_9(%arg0: i32, %arg1: i32) -> (i32, i32, i32) {
    %c0_i32 = arith.constant 0 : i32
    %c0_i32_0 = arith.constant 0 : i32
    %c0_i32_1 = arith.constant 0 : i32
    return %arg1, %c0_i32, %c0_i32_0 : i32, i32, i32
  }
  func.func @transform_10(%arg0: i32, %arg1: i32) -> (i32, i32, i32) {
    %c0_i32 = arith.constant 0 : i32
    %c0_i32_0 = arith.constant 0 : i32
    %c0_i32_1 = arith.constant 0 : i32
    return %arg1, %c0_i32, %c0_i32_0 : i32, i32, i32
  }
  func.func @transform_11(%arg0: i32, %arg1: i32) -> (i32, i32, i32) {
    %c0_i32 = arith.constant 0 : i32
    %c0_i32_0 = arith.constant 0 : i32
    %c0_i32_1 = arith.constant 0 : i32
    return %arg1, %c0_i32, %c0_i32_0 : i32, i32, i32
  }
  func.func @transform_12(%arg0: i32, %arg1: i32) -> (i32, i32, i32) {
    %c0_i32 = arith.constant 0 : i32
    %c0_i32_0 = arith.constant 0 : i32
    %c0_i32_1 = arith.constant 0 : i32
    return %arg1, %c0_i32, %c0_i32_0 : i32, i32, i32
  }
  func.func @transform_13(%arg0: i32, %arg1: i32) -> (i32, i32, i32) {
    %c0_i32 = arith.constant 0 : i32
    %c0_i32_0 = arith.constant 0 : i32
    %c0_i32_1 = arith.constant 0 : i32
    return %arg1, %c0_i32, %c0_i32_0 : i32, i32, i32
  }
  func.func @transform_14(%arg0: i32, %arg1: i32) -> (i32, i32) {
    %c0_i32 = arith.constant 0 : i32
    %c0_i32_0 = arith.constant 0 : i32
    %c0_i32_1 = arith.constant 0 : i32
    return %c0_i32, %c0_i32_0 : i32, i32
  }
  func.func @transform_15(%arg0: i32, %arg1: i32) -> (i32, i32) {
    %c0_i32 = arith.constant 0 : i32
    %c0_i32_0 = arith.constant 0 : i32
    %c0_i32_1 = arith.constant 0 : i32
    return %c0_i32, %c0_i32_0 : i32, i32
  }
  func.func @transform_16(%arg0: i32, %arg1: i32) -> (i32, i32, i32) {
    %c0_i32 = arith.constant 0 : i32
    %c0_i32_0 = arith.constant 0 : i32
    %c0_i32_1 = arith.constant 0 : i32
    return %arg0, %c0_i32, %c0_i32_0 : i32, i32, i32
  }
}

module attributes {stable_mosaic.version = 11 : i64} {
  func.func @_linear_kernel(%arg0: i32, %arg1: memref<32x48xbf16, #tpu.memory_space<vmem>>, %arg2: memref<48x32xbf16, #tpu.memory_space<vmem>>, %arg3: memref<1x32xf32, #tpu.memory_space<vmem>>, %arg4: memref<32x32xf32, #tpu.memory_space<vmem>>) attributes {dimension_semantics = [#tpu.dimension_semantics<parallel>], iteration_bounds = array<i64: 1>, scalar_prefetch = 0 : i64, scratch_operands = 0 : i64, tpu.core_type = #tpu.core_type<tc>, window_params = [{transform_indices = @transform_0, window_bounds = array<i64: 32, 48>}, {pipeline_mode = #tpu.pipeline_mode<synchronous>, transform_indices = @transform_1, window_bounds = array<i64: 48, 32>}, {pipeline_mode = #tpu.pipeline_mode<synchronous>, transform_indices = @transform_2, window_bounds = array<i64: 1, 32>}, {transform_indices = @transform_3, window_bounds = array<i64: 32, 32>}]} {
    %c0 = arith.constant 0 : index
    %c0_0 = arith.constant 0 : index
    %0 = vector.load %arg1[%c0, %c0_0] : memref<32x48xbf16, #tpu.memory_space<vmem>>, vector<32x48xbf16>
    %c0_1 = arith.constant 0 : index
    %c0_2 = arith.constant 0 : index
    %1 = vector.load %arg2[%c0_1, %c0_2] : memref<48x32xbf16, #tpu.memory_space<vmem>>, vector<48x32xbf16>
    %cst = arith.constant dense<0.000000e+00> : vector<32x32xf32>
    %2 = tpu.matmul %0, %1, %cst {dimension_numbers = #tpu.dot_dimension_numbers<[1], [0], [0], [1], [0, 0, 1, 1], [], []>} : vector<32x48xbf16>, vector<48x32xbf16>, vector<32x32xf32> -> vector<32x32xf32>
    %c0_3 = arith.constant 0 : index
    %c0_4 = arith.constant 0 : index
    %3 = vector.load %arg3[%c0_3, %c0_4] : memref<1x32xf32, #tpu.memory_space<vmem>>, vector<1x32xf32>
    %4 = vector.broadcast %3 : vector<1x32xf32> to vector<32x32xf32>
    %5 = arith.addf %2, %4 : vector<32x32xf32>
    %c0_5 = arith.constant 0 : index
    %c0_6 = arith.constant 0 : index
    %6 = vector.load %arg4[%c0_5, %c0_6] : memref<32x32xf32, #tpu.memory_space<vmem>>, vector<32x32xf32>
    tpu.vector_store %arg4[%c0_5, %c0_6], %5 {strides = array<i32>} : memref<32x32xf32, #tpu.memory_space<vmem>>, vector<32x32xf32>,
    return
  }
  func.func @transform_0(%arg0: i32) -> (i32, i32) {
    %c0_i32 = arith.constant 0 : i32
    %c0_i32_0 = arith.constant 0 : i32
    return %arg0, %c0_i32 : i32, i32
  }
  func.func @transform_1(%arg0: i32) -> (i32, i32) {
    %c0_i32 = arith.constant 0 : i32
    %c0_i32_0 = arith.constant 0 : i32
    %c0_i32_1 = arith.constant 0 : i32
    return %c0_i32, %c0_i32_0 : i32, i32
  }
  func.func @transform_2(%arg0: i32) -> (i32, i32) {
    %c0_i32 = arith.constant 0 : i32
    %c0_i32_0 = arith.constant 0 : i32
    %c0_i32_1 = arith.constant 0 : i32
    return %c0_i32, %c0_i32_0 : i32, i32
  }
  func.func @transform_3(%arg0: i32) -> (i32, i32) {
    %c0_i32 = arith.constant 0 : i32
    %c0_i32_0 = arith.constant 0 : i32
    return %arg0, %c0_i32 : i32, i32
  }
}

</mosaic_0001>

<bundles_post_ra>
// kernel: vit_forward.2
= control target key start
LH: loop header
LB: loop body
LE: loop exit
PB: predicated region body
PF: predicated region fallthrough
CT: control target
= control target key end

     0   :  { %vm60_vm0 = vcmask 392192   ;;  %vm116_vm1 = vcmask 261120   ;;  %s203_s1 = inlined_call_operand.vmem [shape: bf16[48,32], index: 1, kind: input, shape index: {}]   ;;  %s204_s0 = inlined_call_operand.vmem [shape: bf16[32,48], index: 0, kind: input, shape index: {}]   ;;  %s205_s2 = inlined_call_operand.vmem [shape: f32[1,32], index: 2, kind: input, shape index: {}]   ;;  %s206_s3 = inlined_call_operand.vmem [shape: f32[32,32], index: 3, kind: output, shape index: {}]  }
   0x1   :  { %v148_v0 = vld [vmem:[%s203_s1 + $0x10] sm:$0xff]   ;;  %v149_v1 = vld [vmem:[%s203_s1 + $0x8] sm:$0xff]   ;;  %v151_v2 = vld [vmem:[%s204_s0] sm:$0xff]  }
   0x2   :  { %138 = vmatprep.subr.bf16.mxu0 %v148_v0  ;;  %v150_v3 = vld [vmem:[%s203_s1] sm:$0xff]   ;;  %144 = vmatprep.mubr.msk.bf16.mxu0 %vm60_vm0, %v151_v2  ;;  %v152_v4 = vld [vmem:[%s204_s0 + $0x8] sm:$0xff]  }
   0x3   :  { %139 = vmatpush3.bf16.msra.mxu0 %v148_v0  ;;  %v125_v5 = vld [vmem:[%s205_s2] ss:$0 sm:$0xff] }
   0x4   :  { %140 = vmatprep.subr.bf16.mxu0 %v149_v1 }
   0x7   :  { %141 = vmatpush3.bf16.msra.mxu0 %v149_v1 }
   0x8   :  { %142 = vmatprep.subr.bf16.mxu0 %v150_v3 }
   0xb   :  { %143 = vmatpush3.bf16.msra.mxu0 %v150_v3 }
   0xe   :  { %145 = vmatmul.mubr.msk.bf16.vlgmr.msra.gmra.mxu0 %vm60_vm0, %v152_v4 }
  0xce   :  { %v146_v6 = vpop.f32.mrf.mxu0 }
  0xcf   :  { %v110_v7 = vadd.f32 %v146_v6, %v125_v5 }
  0xd0   :  { %v101_v8 = vpop.f32.mrf.mxu0 }
  0xd1   :  { %119 = vst.msk [vmem:[%s206_s3 + $0x10] sm:$0xff] %vm116_vm1, %v110_v7  ;;  %v102_v9 = vadd.f32 %v125_v5, %v101_v8 }
  0xd2   :  { %v147_v10 = vpop.f32.mrf.mxu0 }
  0xd3   :  { %117 = vst.msk [vmem:[%s206_s3] sm:$0xff] %vm116_vm1, %v102_v9  ;;  %v113_v11 = vadd.f32 %v147_v10, %v125_v5 }
  0xd4   :  { %v104_v12 = vpop.f32.mrf.mxu0 }
  0xd5   :  { %120 = vst.msk [vmem:[%s206_s3 + $0x18] sm:$0xff] %vm116_vm1, %v113_v11  ;;  %v105_v13 = vadd.f32 %v125_v5, %v104_v12 }
  0xd7   :  { %118 = vst.msk [vmem:[%s206_s3 + $0x8] sm:$0xff] %vm116_vm1, %v105_v13 }

// kernel: vit_forward.3
= control target key start
LH: loop header
LB: loop body
LE: loop exit
PB: predicated region body
PF: predicated region fallthrough
CT: control target
= control target key end

     0   :  { %s5191_s21 = smov 0   ;;  %s5193_s22 = smov 0   ;;  %s6197_s0 = inlined_call_operand.vmem [shape: f32[2,32,32], index: 0, kind: input, shape index: {}]   ;;  %s6198_s1 = inlined_call_operand.vmem [shape: f32[2,1,32], index: 1, kind: input, shape index: {}]   ;;  %s6199_s2 = inlined_call_operand.vmem [shape: f32[2,1,32], index: 2, kind: input, shape index: {}]   ;;  %s6200_s3 = inlined_call_operand.vmem [shape: bf16[2,32,32], index: 3, kind: input, shape index: {}]   ;;  %s6201_s4 = inlined_call_operand.vmem [shape: bf16[2,32,32], index: 4, kind: input, shape index: {}]   ;;  %s6202_s5 = inlined_call_operand.vmem [shape: bf16[2,32,32], index: 5, kind: input, shape index: {}]   ;;  %s6203_s6 = inlined_call_operand.vmem [shape: bf16[2,32,32], index: 6, kind: input, shape index: {}]   ;;  %s6204_s7 = inlined_call_operand.vmem [shape: f32[2,1,32], index: 7, kind: input, shape index: {}]   ;;  %s6205_s8 = inlined_call_operand.vmem [shape: f32[2,1,32], index: 8, kind: input, shape index: {}]   ;;  %s6206_s9 = inlined_call_operand.vmem [shape: f32[2,1,32], index: 9, kind: input, shape index: {}]   ;;  %s6207_s10 = inlined_call_operand.vmem [shape: bf16[2,32,128], index: 10, kind: input, shape index: {}]   ;;  %s6208_s11 = inlined_call_operand.vmem [shape: f32[2,1,128], index: 11, kind: input, shape index: {}]   ;;  %s6209_s12 = inlined_call_operand.vmem [shape: bf16[2,128,32], index: 12, kind: input, shape index: {}]   ;;  %s6210_s13 = inlined_call_operand.vmem [shape: f32[2,1,32], index: 13, kind: input, shape index: {}]   ;;  %s6211_s14 = inlined_call_operand.vmem [shape: f32[1,32], index: 14, kind: input, shape index: {}]   ;;  %s6212_s15 = inlined_call_operand.vmem [shape: f32[1,32], index: 15, kind: input, shape index: {}]   ;;  %s6213_s16 = inlined_call_operand.vmem [shape: f32[2,32,32], index: 16, kind: output, shape index: {}]  }
   0x1   :  { %6219 = sst [smem:[#allocation10_spill]] %s6197_s0  ;;  %s5195_s23 = smov 0  }
   0x2   :  { %6220 = sst [smem:[#allocation11_spill]] %s6199_s2  ;;  %s5197_s24 = smov 0  }
   0x3   :  { %6221 = sst [smem:[#allocation12_spill]] %s6200_s3  ;;  %s5199_s25 = smov 0  }
   0x4   :  { %6222 = sst [smem:[#allocation13_spill]] %s6201_s4 }
   0x5   :  { %6223 = sst [smem:[#allocation14_spill]] %s6202_s5 }
   0x6   :  { %6224 = sst [smem:[#allocation15_spill]] %s6203_s6 }
   0x7   :  { %6225 = sst [smem:[#allocation16_spill]] %s6211_s14 }
   0x8   :  { %6226 = sst [smem:[#allocation17_spill]] %s6212_s15 }
   0x9   :  { %6227 = sst [smem:[#allocation18_spill]] %s6213_s16 }
   0xa LB: > { %6228 = sst [smem:[#allocation3_spill]] %s5079_s21  ;;  %s35_s26 = sadd.s32 1, %s5087_s23  ;;  %s5095_s25 = sphi %s5199_s25, %s26_s25   ;;  %s5091_s24 = sphi %s5197_s24, %s6257_s24   ;;  %s5087_s23 = sphi %s5195_s23, %s6256_s23   ;;  %s5083_s22 = sphi %s5193_s22, %s6255_s22   ;;  %s5079_s21 = sphi %s5191_s21, %s6254_s21  }
   0xb   : > { %6229 = sst [smem:[#allocation4_spill]] %s5087_s23  ;;  %s38_s27 = sadd.s32 1, %s5091_s24 }
   0xc   : > { %6230 = sst [smem:[#allocation5_spill]] %s5091_s24  ;;  %p36_p0 = scmp.ge.s32.totalorder %s35_s26, 2 }
   0xd   : > { %6231 = sst [smem:[#allocation6_spill]] %s5095_s25  ;;  %p4582_p1 = scmp.ge.s32.totalorder %s5095_s25, 1 }
   0xe   : > { %p590_p2 = scmp.lt.s32.totalorder %s5095_s25, 5  ;;  %s6259_s26 = smov (%p36_p0, %s35_s26), 0 }
   0xf   : > { %6232 = sst [smem:[#allocation7_spill]] %s6259_s26  ;;  %s6261_s27 = smov (!%p36_p0, %s38_s27), %s5091_s24 }
  0x10   : > { %p591_p3 = pnand %p4582_p1, %p590_p2  ;;  %p40_p4 = scmp.ge.s32.totalorder %s6261_s27, 2 }
  0x12   : > { %s6263_s27 = smov (%p40_p4, %s6261_s27), 0  ;;  %594 = sbr.rel (%p591_p3) target bundleno = 2956 (0xb8c), region = 84 }
  0x13   : > { %6233 = sst [smem:[#allocation8_spill]] %s6263_s27 }
  0x17   : > { %p691_p5 = scmp.lt.s32.totalorder %s5083_s22, 1  ;;  %p696_p6 = scmp.lt.s32.totalorder %s5079_s21, 1 }
  0x18   : > { %s6234_s17 = sld [smem:[#allocation10_spill]] }
  0x19   : > { %s6265_s22 = smov (!%p691_p5, %s5083_s22), 1  ;;  %s6236_s3 = sld [smem:[#allocation12_spill]] }
  0x1a   : > { %s5225_s28 = scalar_select %p696_p6, %s5079_s21, 1 }
  0x1b   : > { %s4688_s29 = sshll.u32 %s6265_s22, 5  ;;  %s6237_s4 = sld [smem:[#allocation13_spill]] }
  0x1c   : > { %s4689_s25 = sshll.u32 %s5225_s28, 4  ;;  %s6238_s5 = sld [smem:[#allocation14_spill]] }
  0x1d   : > { %s6239_s6 = sld [smem:[#allocation15_spill]] }
  0x1e   : > { %s695_s18 = scalar_lea.vmem %s6234_s17, %s4688_s29  ;;  %s6241_s16 = sld [smem:[#allocation18_spill]] }
  0x1f   : > { %s5242_s21 = scalar_lea.vmem %s6236_s3, %s4689_s25 }
  0x21   : > { %s5247_s30 = scalar_lea.vmem %s6237_s4, %s4689_s25  ;;  %s746_s4 = scalar_lea.vmem %s6210_s13, %s5225_s28 }
  0x22   : > { %s5252_s19 = scalar_lea.vmem %s6238_s5, %s4689_s25  ;;  %s5274_s5 = scalar_lea.vmem %s6207_s10, %s4689_s25 }
  0x23   : > { %s5257_s24 = scalar_lea.vmem %s6239_s6, %s4689_s25  ;;  %s738_s6 = scalar_lea.vmem %s6208_s11, %s5225_s28 }
  0x24   : > { %6240 = sst [smem:[#allocation9_spill]] %s5257_s24  ;;  %s4694_s24 = sshll.u32 %s5225_s28, 6 }
  0x25   : > { %s5284_s14 = scalar_lea.vmem %s6209_s12, %s4694_s24  ;;  %s5293_s0 = scalar_lea.vmem %s6241_s16, %s4688_s29 }
  0x26   : > { %s6242_s25 = sld [smem:[#allocation3_spill]] }
  0x2c   : > { %p4599_p7 = scmp.ne.s32.totalorder %s6242_s25, 0 }
  0x2e   : > { %756 = sbr.rel (%p4599_p7) target bundleno = 54 (0x36), region = 88 }
  0x33   : > { %v757_v0 = vld [vmem:[%s695_s18] sm:$0xff]  ;;  %vm761_vm0 = vcmask 261120   ;;  %v758_v1 = vld [vmem:[%s695_s18 + $0x8] sm:$0xff]  ;;  %v759_v2 = vld [vmem:[%s695_s18 + $0x10] sm:$0xff] }
  0x34   : > { %762 = vst.msk [vmem:[#allocation2] sm:$0xff] %vm761_vm0, %v757_v0  ;;  %763 = vst.msk [vmem:[#allocation2 + $0x8] sm:$0xff] %vm761_vm0, %v758_v1  ;;  %v760_v3 = vld [vmem:[%s695_s18 + $0x18] sm:$0xff] }
  0x35   : > { %764 = vst.msk [vmem:[#allocation2 + $0x10] sm:$0xff] %vm761_vm0, %v759_v2  ;;  %765 = vst.msk [vmem:[#allocation2 + $0x18] sm:$0xff] %vm761_vm0, %v760_v3 }
  0x36 PF: > { %vm772_vm1 = vcmask 261120   ;;  %v4939_v32 = vld [vmem:[%s5242_s21 + $0x8] sm:$0xff]   ;;  %v4940_v33 = vld [vmem:[%s5242_s21] sm:$0xff]   ;;  %s6243_s29 = scalar_lea.vmem %s6198_s1, %s5225_s28  ;;  %s6244_s16 = sld [smem:[#allocation11_spill]]  ;;  %vm2671_vm2 = vcmask 64512   ;;  %vm3890_vm4 = vcmask 195584  }
  0x37   : > { %4758 = vmatprep.subr.bf16.mxu0 %v4939_v32  ;;  %v4941_v34 = vld [vmem:[%s5247_s30 + $0x8] sm:$0xff]   ;;  %v4600_v49 = vld [vmem:[%s6243_s29] ss:$0 sm:$0xff]  ;;  %s5099_s27 = smov 104   ;;  %s6246_s20 = sld [smem:[#allocation9_spill]]  ;;  %vm3885_vm5 = vcmask 130048  }
  0x38   : > { %4759 = vmatpush3.bf16.msra.mxu0 %v4939_v32  ;;  %v4942_v3 = vld [vmem:[%s5247_s30] sm:$0xff]   ;;  %s5097_s30 = smov 112   ;;  %s5103_s23 = smov 16  }
  0x39   : > { %4760 = vmatprep.subr.bf16.mxu0 %v4940_v33  ;;  %s5104_s26 = smov 8   ;;  %s5105_s3 = smov 24  }
  0x3a   : > { %s6247_s25 = scalar_lea.vmem %s6204_s7, %s5225_s28  ;;  %s6248_s21 = scalar_lea.vmem %s6205_s8, %s5225_s28 }
  0x3b   : > { %v766_v4 = vld [vmem:[#allocation2] sm:$0xff]  ;;  %v767_v6 = vld [vmem:[#allocation2 + $0x8] sm:$0xff]  ;;  %s6249_s24 = scalar_lea.vmem %s6206_s9, %s5225_s28 }
  0x3c   : > { %v768_v5 = vld [vmem:[#allocation2 + $0x10] sm:$0xff]  ;;  %v773_v7 = vsel %vm772_vm1, %v766_v4, 0.0  ;;  %v769_v9 = vld [vmem:[#allocation2 + $0x18] sm:$0xff]  ;;  %v776_v10 = vsel %vm772_vm1, %v767_v6, 0.0  ;;  %4761 = vmatpush3.bf16.msra.mxu0 %v4940_v33  ;;  %s6245_s17 = scalar_lea.vmem %s6244_s16, %s5225_s28  ;;  %s6250_s28 = sld [smem:[#allocation3_spill]] }
  0x3d   : > { %v779_v8 = vsel %vm772_vm1, %v768_v5, 0.0  ;;  %774 = vadd.xlane.f32.xlu0 %v773_v7  ;;  %v782_v11 = vsel %vm772_vm1, %v769_v9, 0.0  ;;  %4766 = vmatprep.subr.bf16.mxu0 %v4941_v34  ;;  %v4601_v54 = vld [vmem:[%s6245_s17] ss:$0 sm:$0xff] }
  0x3e   : > { %780 = vadd.xlane.f32.xlu1 %v779_v8 }
  0x41   : > { %777 = vadd.xlane.f32.xlu0 %v776_v10 }
  0x42   : > { %783 = vadd.xlane.f32.xlu1 %v782_v11  ;;  %p4683_p8 = scmp.ne.s32.totalorder %s6250_s28, 1 }
  0xc6   : > { %v775_v12 = vpop.xlane.xlu0 %774 }
  0xc7   : > { %v781_v13 = vpop.xlane.xlu1 %780  ;;  %v786_v14 = vmul.f32 0.03125, %v775_v12 }
  0xc8   : > { %v788_v15 = vmul.f32 0.03125, %v781_v13 }
  0xc9   : > { %v790_v16 = vsub.f32 %v766_v4, %v786_v14  ;;  %v4943_v4 = vld [vmem:[%s5252_s19 + $0x8] sm:$0xff]  }
  0xca   : > { %v792_v17 = vsub.f32 %v768_v5, %v788_v15  ;;  %v778_v18 = vpop.xlane.xlu0 %777  ;;  %v4944_v5 = vld [vmem:[%s5252_s19] sm:$0xff]   ;;  %s5098_s19 = smov 120  }
  0xcb   : > { %v784_v19 = vpop.xlane.xlu1 %783  ;;  %v787_v20 = vmul.f32 0.03125, %v778_v18  ;;  %v794_v22 = vmul.f32 %v790_v16, %v790_v16  ;;  %v5100_v18 = vmov 1983009808  }
  0xcc   : > { %v789_v21 = vmul.f32 0.03125, %v784_v19  ;;  %v796_v23 = vmul.f32 %v792_v17, %v792_v17  ;;  %v1105_v19 = vunpack.c.l.s4 %v5100_v18 }
  0xcd   : > { %v791_v24 = vsub.f32 %v767_v6, %v787_v20  ;;  %v798_v26 = vsel %vm772_vm1, %v794_v22, 0.0  ;;  %v1107_v20 = vlaneseq }
  0xce   : > { %v793_v25 = vsub.f32 %v769_v9, %v789_v21  ;;  %799 = vadd.xlane.f32.xlu0 %v798_v26  ;;  %v804_v27 = vsel %vm772_vm1, %v796_v23, 0.0  ;;  %v1106_v21 = vunpack.c.0.s8 %v1105_v19  ;;  %v5101_v23 = vmov 1934713408  }
  0xcf   : > { %v795_v28 = vmul.f32 %v791_v24, %v791_v24  ;;  %v1108_v22 = vshrl.u32 %v1107_v20, 7  ;;  %v5102_v26 = vmov 0  }
  0xd0   : > { %v797_v29 = vmul.f32 %v793_v25, %v793_v25 }
  0xd1   : > { %v801_v30 = vsel %vm772_vm1, %v795_v28, 0.0  ;;  %v5351_v32 = vsub.s32 %v1106_v21, %v1108_v22 }
  0xd2   : > { %805 = vadd.xlane.f32.xlu0 %v804_v27  ;;  %802 = vadd.xlane.f32.xlu1 %v801_v30  ;;  %v807_v31 = vsel %vm772_vm1, %v797_v29, 0.0  ;;  %v5349_v27 = vpack.i.b16 %v5102_v26, %v5102_v26 }
  0xd6   : > { %808 = vadd.xlane.f32.xlu1 %v807_v31 }
 0x157   : > { %v800_v35 = vpop.xlane.xlu0 %799 }
 0x158   : > { %v810_v36 = vmul.f32 0.03125, %v800_v35 }
 0x15a   : > { %v814_v37 = vadd.f32 1e-05, %v810_v36 }
 0x15b   : > { %v803_v38 = vpop.xlane.xlu1 %802  ;;  %v806_v39 = vpop.xlane.xlu0 %805 }
 0x15c   : > { %4957 = vrsqrt.f32 %v814_v37  ;;  %v811_v40 = vmul.f32 0.03125, %v803_v38  ;;  %v812_v41 = vmul.f32 0.03125, %v806_v39 }
 0x15e   : > { %v815_v42 = vadd.f32 1e-05, %v811_v40  ;;  %v816_v43 = vadd.f32 1e-05, %v812_v41 }
 0x15f   : > { %v809_v44 = vpop.xlane.xlu1 %808 }
 0x160   : > { %4959 = vrsqrt.f32 %v815_v42  ;;  %v813_v45 = vmul.f32 0.03125, %v809_v44 }
 0x161   : > { %4961 = vrsqrt.f32 %v816_v43 }
 0x162   : > { %v817_v46 = vadd.f32 1e-05, %v813_v45 }
 0x164   : > { %4963 = vrsqrt.f32 %v817_v46 }
 0x169   : > { %v4958_v47 = vpop.eup %4957 }
 0x16a   : > { %v822_v48 = vmul.f32 %v4958_v47, %v790_v16 }
 0x16c   : > { %v832_v53 = vmul.f32 %v4600_v49, %v822_v48 }
 0x16d   : > { %v4960_v50 = vpop.eup %4959 }
 0x16e   : > { %v4962_v51 = vpop.eup %4961  ;;  %v823_v52 = vmul.f32 %v4960_v50, %v791_v24  ;;  %v842_v58 = vadd.f32 %v4601_v54, %v832_v53  ;;  %v1136_v24 = vunpack.c.l.s4 %v5101_v23 }
 0x16f   : > { %v824_v55 = vmul.f32 %v4962_v51, %v792_v17 }
 0x170   : > { %v833_v56 = vmul.f32 %v4600_v49, %v823_v52 }
 0x171   : > { %v4964_v57 = vpop.eup %4963  ;;  %v834_v61 = vmul.f32 %v4600_v49, %v824_v55 }
 0x172   : > { %v843_v59 = vadd.f32 %v4601_v54, %v833_v56  ;;  %v825_v60 = vmul.f32 %v4964_v57, %v793_v25 }
 0x173   : > { %v844_v0 = vadd.f32 %v4601_v54, %v834_v61 }
 0x174   : > { %v846_v62 = vpack.c.bf16 %v843_v59, %v842_v58  ;;  %v835_v63 = vmul.f32 %v4600_v49, %v825_v60 }
 0x176   : > { %4762 = vmatprep.mubr.msk.bf16.mxu0 %vm772_vm1, %v846_v62  ;;  %v845_v1 = vadd.f32 %v4601_v54, %v835_v63 }
 0x178   : > { %v847_v2 = vpack.c.bf16 %v845_v1, %v844_v0 }
 0x17a   : > { %4763 = vmatmul.mubr.msk.bf16.vlgmr.msra.gmra.mxu0 %vm772_vm1, %v847_v2 }
 0x17b   : > { %4767 = vmatpush3.bf16.msra.mxu0 %v4941_v34  ;;  %4770 = vmatprep.mubr.msk.bf16.mxu0 %vm772_vm1, %v846_v62  ;;  %v1137_v34 = vunpack.c.0.s8 %v1136_v24 }
 0x17c   : > { %4768 = vmatprep.subr.bf16.mxu0 %v4942_v3 }
 0x17d   : > { %v5358_v43 = vsub.s32 %v1137_v34, %v1108_v22 }
 0x17f   : > { %4769 = vmatpush3.bf16.msra.mxu0 %v4942_v3 }
 0x180   : > { %4774 = vmatprep.subr.bf16.mxu0 %v4943_v4 }
 0x182   : > { %4771 = vmatmul.mubr.msk.bf16.vlgmr.msra.gmra.mxu0 %vm772_vm1, %v847_v2 }
 0x183   : > { %4775 = vmatpush3.bf16.msra.mxu0 %v4943_v4  ;;  %4778 = vmatprep.mubr.msk.bf16.mxu0 %vm772_vm1, %v846_v62 }
 0x184   : > { %4776 = vmatprep.subr.bf16.mxu0 %v4944_v5 }
 0x187   : > { %4777 = vmatpush3.bf16.msra.mxu0 %v4944_v5 }
 0x18a   : > { %4779 = vmatmul.mubr.msk.bf16.vlgmr.msra.gmra.mxu0 %vm772_vm1, %v847_v2 }
 0x23a   : > { %v4764_v6 = vpop.f32.mrf.mxu0 }
 0x23c   : > { %v904_v7 = vpop.f32.mrf.mxu0 }
 0x23e   : > { %v4765_v8 = vpop.f32.mrf.mxu0 }
 0x23f   : > { %v5339_v17 = vpack.c.bf16 %v4765_v8, %v4764_v6 }
 0x240   : > { %v907_v9 = vpop.f32.mrf.mxu0 }
 0x241   : > { %v1049_v16 = vpack.c.bf16 %v907_v9, %v904_v7  ;;  %v1091_v6 = vshrl.u32 %v5339_v17, 16 }
 0x242   : > { %v4772_v10 = vpop.f32.mrf.mxu0 }
 0x243   : > { %v1069_v48 = vshrl.u32 %v1049_v16, 16 }
 0x244   : > { %v969_v11 = vpop.f32.mrf.mxu0 }
 0x246   : > { %v4773_v12 = vpop.f32.mrf.mxu0 }
 0x247   : > { %v1592_v13 = vpack.c.bf16 %v4773_v12, %v4772_v10 }
 0x248   : > { %v972_v14 = vpop.f32.mrf.mxu0 }
 0x249   : > { %1601 = vrot.lane.b32.xlu1 %v1592_v13, %s5097_s30  ;;  %1597 = vrot.lane.b32.xlu0 %v1592_v13, %s5098_s19  ;;  %v5328_v15 = vpack.c.bf16 %v972_v14, %v969_v11  ;;  %v1627_v30 = vshrl.u32 %v1592_v13, 16 }
 0x24b   : > { %v1611_v10 = vshrl.u32 %v5328_v15, 16 }
 0x24d   : > { %1605 = vrot.lane.b32.xlu1 %v1592_v13, %s5099_s27  ;;  %1599 = vrot.lane.b32.xlu0 %v5328_v15, %s5097_s30 }
 0x251   : > { %1053 = vrot.lane.b32.xlu0 %v1049_v16, %s5098_s19  ;;  %1595 = vrot.lane.b32.xlu1 %v5328_v15, %s5098_s19 }
 0x255   : > { %1061 = vrot.lane.b32.xlu0 %v1049_v16, %s5099_s27  ;;  %1603 = vrot.lane.b32.xlu1 %v5328_v15, %s5099_s27 }
 0x259   : > { %1059 = vrot.lane.b32.xlu0 %v5339_v17, %s5097_s30  ;;  %1057 = vrot.lane.b32.xlu1 %v1049_v16, %s5097_s30 }
 0x25d   : > { %1055 = vrot.lane.b32.xlu1 %v5339_v17, %s5098_s19 }
 0x261   : > { %1063 = vrot.lane.b32.xlu1 %v5339_v17, %s5099_s27 }
 0x2bb   : > { %v1602_v25 = vpop.permute.xlu1 %1601  ;;  %v1598_v28 = vpop.permute.xlu0 %1597 }
 0x2bc   : > { %v1625_v29 = vpack.i.b16 %v1598_v28, %v1592_v13  ;;  %v1628_v31 = vshrl.u32 %v1598_v28, 16  ;;  %v1635_v39 = vshrl.u32 %v1602_v25, 16 }
 0x2be   : > { %v1629_v33 = vpack.i.b16 %v1628_v31, %v1627_v30  ;;  %v1771_v35 = vcombine.high %v1625_v29, %v5349_v27  ;;  %v1778_v42 = vrot.slane %v1625_v29, %v5351_v32 }
 0x2bf   : > { %v1606_v36 = vpop.permute.xlu1 %1605  ;;  %v5354_v37 = vpop.permute.xlu0 %1599 }
 0x2c0   : > { %v1633_v38 = vpack.i.b16 %v1606_v36, %v1602_v25  ;;  %v1837_v40 = vcombine.high %v1629_v33, %v5349_v27  ;;  %v1636_v41 = vshrl.u32 %v1606_v36, 16  ;;  %v1785_v46 = vrot.slane %v1771_v35, %v5351_v32 }
 0x2c1   : > { %v1844_v51 = vrot.slane %v1629_v33, %v5351_v32  ;;  %v1619_v9 = vshrl.u32 %v5354_v37, 16 }
 0x2c2   : > { %v1786_v44 = vcombine.high %v1633_v38, %v5349_v27  ;;  %v1793_v45 = vrot.slane %v1633_v38, %v5351_v32  ;;  %v1637_v47 = vpack.i.b16 %v1636_v41, %v1635_v39  ;;  %v1851_v55 = vrot.slane %v1837_v40, %v5351_v32 }
 0x2c3   : > { %v1054_v49 = vpop.permute.xlu0 %1053  ;;  %v1596_v50 = vpop.permute.xlu1 %1595 }
 0x2c4   : > { %v1800_v52 = vrot.slane %v1786_v44, %v5351_v32  ;;  %v1801_v53 = vcombine.low %v1778_v42, %v1793_v45  ;;  %v1802_v54 = vcombine.high %v1778_v42, %v1793_v45  ;;  %v1852_v56 = vcombine.high %v1637_v47, %v5349_v27 }
 0x2c5   : > { %v1859_v57 = vrot.slane %v1637_v47, %v5351_v32  ;;  %v1070_v58 = vshrl.u32 %v1054_v49, 16  ;;  %v1609_v2 = vpack.i.b16 %v1596_v50, %v5328_v15  ;;  %v5376_v4 = vpack.i.b16 %v1054_v49, %v1049_v16 }
 0x2c6   : > { %v5369_v59 = vrot.slane %v1801_v53, %v5358_v43  ;;  %v5372_v60 = vrot.slane %v1802_v54, %v5358_v43  ;;  %v1817_v61 = vcombine.low %v1785_v46, %v1800_v52  ;;  %v1818_v62 = vcombine.high %v1785_v46, %v1800_v52 }
 0x2c7   : > { %v1866_v63 = vrot.slane %v1852_v56, %v5351_v32  ;;  %v1867_v0 = vcombine.low %v1844_v51, %v1859_v57  ;;  %v1868_v1 = vcombine.high %v1844_v51, %v1859_v57  ;;  %v1604_v3 = vpop.permute.xlu1 %1603  ;;  %v5378_v5 = vpack.i.b16 %v1070_v58, %v1069_v48  ;;  %v1062_v15 = vpop.permute.xlu0 %1061 }
 0x2c8   : > { %v5382_v7 = vrot.slane %v1817_v61, %v5358_v43  ;;  %v5387_v11 = vrot.slane %v1818_v62, %v5358_v43  ;;  %v2003_v13 = vcombine.low %v5369_v59, %v5372_v60  ;;  %v4626_v14 = vcombine.high %v5369_v59, %v5372_v60 }
 0x2c9   : > { %v1883_v8 = vcombine.low %v1851_v55, %v1866_v63  ;;  %v1884_v12 = vcombine.high %v1851_v55, %v1866_v63  ;;  %v5394_v16 = vrot.slane %v1867_v0, %v5358_v43  ;;  %v5397_v18 = vrot.slane %v1868_v1, %v5358_v43 }
 0x2ca   : > { %v1612_v19 = vshrl.u32 %v1596_v50, 16  ;;  %v1639_v21 = vcombine.high %v1609_v2, %v5349_v27  ;;  %v1103_v23 = vcombine.high %v5376_v4, %v5349_v27  ;;  %v5404_v24 = vrot.slane %v5376_v4, %v5351_v32 }
 0x2cb   : > { %v1058_v22 = vpop.permute.xlu1 %1057  ;;  %v1169_v25 = vcombine.high %v5378_v5, %v5349_v27  ;;  %v5410_v26 = vrot.slane %v5378_v5, %v5351_v32  ;;  %v5413_v28 = vrot.slane %v1883_v8, %v5358_v43  ;;  %v1617_v30 = vpack.i.b16 %v1604_v3, %v5354_v37 }
 0x2cc   : > { %v1613_v29 = vpack.i.b16 %v1612_v19, %v1611_v10  ;;  %v1620_v31 = vshrl.u32 %v1604_v3, 16  ;;  %v5417_v33 = vrot.slane %v1884_v12, %v5358_v43  ;;  %v1646_v34 = vrot.slane %v1609_v2, %v5351_v32  ;;  %v1060_v12 = vpop.permute.xlu0 %1059 }
 0x2cd   : > { %v1078_v35 = vshrl.u32 %v1062_v15, 16  ;;  %v1075_v36 = vpack.i.b16 %v1062_v15, %v1058_v22  ;;  %v1653_v38 = vrot.slane %v1639_v21, %v5351_v32  ;;  %v1654_v41 = vcombine.high %v1617_v30, %v5349_v27 }
 0x2ce   : > { %v1705_v39 = vcombine.high %v1613_v29, %v5349_v27  ;;  %v1621_v40 = vpack.i.b16 %v1620_v31, %v1619_v9  ;;  %v1661_v42 = vrot.slane %v1617_v30, %v5351_v32  ;;  %v1077_v44 = vshrl.u32 %v1058_v22, 16 }
 0x2cf   : > { %v1118_v37 = vcombine.high %v1075_v36, %v5349_v27  ;;  %v1125_v45 = vrot.slane %v1075_v36, %v5351_v32  ;;  %v1712_v46 = vrot.slane %v1613_v29, %v5351_v32  ;;  %v1668_v47 = vrot.slane %v1654_v41, %v5351_v32  ;;  %v1056_v4 = vpop.permute.xlu1 %1055 }
 0x2d0   : > { %v1720_v48 = vcombine.high %v1621_v40, %v5349_v27  ;;  %v1727_v49 = vrot.slane %v1621_v40, %v5351_v32  ;;  %v1719_v50 = vrot.slane %v1705_v39, %v5351_v32  ;;  %v1669_v51 = vcombine.low %v1646_v34, %v1661_v42 }
 0x2d1   : > { %v1670_v52 = vcombine.high %v1646_v34, %v1661_v42  ;;  %v5432_v53 = vrot.slane %v1118_v37, %v5351_v32  ;;  %v1685_v54 = vcombine.low %v1653_v38, %v1668_v47  ;;  %v1686_v55 = vcombine.high %v1653_v38, %v1668_v47 }
 0x2d2   : > { %v1734_v56 = vrot.slane %v1720_v48, %v5351_v32  ;;  %v1735_v57 = vcombine.low %v1712_v46, %v1727_v49  ;;  %v1677_v58 = vrot.slane %v1669_v51, %v5358_v43  ;;  %v1736_v62 = vcombine.high %v1712_v46, %v1727_v49 }
 0x2d3   : > { %v1684_v61 = vrot.slane %v1670_v52, %v5358_v43  ;;  %v1133_v63 = vcombine.low %v5404_v24, %v1125_v45  ;;  %v1693_v0 = vrot.slane %v1685_v54, %v5358_v43  ;;  %v1700_v1 = vrot.slane %v1686_v55, %v5358_v43  ;;  %v1064_v37 = vpop.permute.xlu1 %1063 }
 0x2d4   : > { %v1743_v2 = vrot.slane %v1735_v57, %v5358_v43  ;;  %v1751_v3 = vcombine.low %v1719_v50, %v1734_v56  ;;  %v1750_v5 = vrot.slane %v1736_v62, %v5358_v43  ;;  %v1752_v8 = vcombine.high %v1719_v50, %v1734_v56 }
 0x2d5   : > { %v1903_v9 = vcombine.low %v1677_v58, %v1684_v61  ;;  %v4622_v10 = vcombine.high %v1677_v58, %v1684_v61  ;;  %v5443_v19 = vrot.slane %v1103_v23, %v5351_v32  ;;  %v1919_v21 = vcombine.low %v1693_v0, %v1700_v1 }
 0x2d6   : > { %v1079_v15 = vpack.i.b16 %v1078_v35, %v1077_v44  ;;  %v1134_v22 = vcombine.high %v5404_v24, %v1125_v45  ;;  %v5447_v29 = vrot.slane %v1751_v3, %v5358_v43  ;;  %v5450_v30 = vrot.slane %v1752_v8, %v5358_v43 }
 0x2d7   : > { %v4623_v31 = vcombine.high %v1693_v0, %v1700_v1  ;;  %v1953_v34 = vcombine.low %v1743_v2, %v1750_v5  ;;  %v5453_v36 = vrot.slane %v1169_v25, %v5351_v32  ;;  %v4624_v38 = vcombine.high %v1743_v2, %v1750_v5 }
 0x2d8   : > { %v1099_v39 = vshrl.u32 %v1060_v12, 16  ;;  %v5459_v23 = vrot.slane %v2003_v13, %v5351_v32  ;;  %v5462_v24 = vrot.slane %v1903_v9, %v5351_v32  ;;  %v5465_v35 = vrot.slane %v4622_v10, %v5351_v32 }
 0x2d9   : > { %v5468_v40 = vrot.slane %v1133_v63, %v5358_v43  ;;  %v1149_v25 = vcombine.low %v5443_v19, %v5432_v53  ;;  %v5473_v41 = vrot.slane %v1919_v21, %v5351_v32  ;;  %v5476_v42 = vrot.slane %v1134_v22, %v5358_v43 }
 0x2da   : > { %v1184_v13 = vcombine.high %v1079_v15, %v5349_v27  ;;  %v1191_v44 = vrot.slane %v1079_v15, %v5351_v32  ;;  %v5481_v45 = vrot.slane %v4623_v31, %v5351_v32  ;;  %v5484_v46 = vrot.slane %v1953_v34, %v5351_v32 }
 0x2db   : > { %v1969_v47 = vcombine.low %v5447_v29, %v5450_v30  ;;  %v1089_v48 = vpack.i.b16 %v1056_v4, %v5339_v17  ;;  %v5490_v49 = vrot.slane %v4624_v38, %v5351_v32  ;;  %v4625_v50 = vcombine.high %v5447_v29, %v5450_v30 }
 0x2dc   : > { %v1150_v51 = vcombine.high %v5443_v19, %v5432_v53  ;;  %v1198_v52 = vrot.slane %v1184_v13, %v5351_v32  ;;  %v5498_v54 = vrot.slane %v1149_v25, %v5358_v43  ;;  %v1092_v55 = vshrl.u32 %v1056_v4, 16 }
 0x2dd   : > { %v1235_v56 = vcombine.high %v1089_v48, %v5349_v27  ;;  %v1097_v57 = vpack.i.b16 %v1064_v37, %v1060_v12  ;;  %v1199_v58 = vcombine.low %v5410_v26, %v1191_v44  ;;  %v1200_v61 = vcombine.high %v5410_v26, %v1191_v44 }
 0x2de   : > { %v1367_v62 = vcombine.low %v5468_v40, %v5476_v42  ;;  %v1242_v63 = vrot.slane %v1089_v48, %v5351_v32  ;;  %v1215_v53 = vcombine.low %v5453_v36, %v1198_v52  ;;  %v1093_v0 = vpack.i.b16 %v1092_v55, %v1091_v6 }
 0x2df   : > { %v1100_v1 = vshrl.u32 %v1064_v37, 16  ;;  %v1250_v2 = vcombine.high %v1097_v57, %v5349_v27  ;;  %v1216_v3 = vcombine.high %v5453_v36, %v1198_v52  ;;  %v1249_v4 = vrot.slane %v1235_v56, %v5351_v32 }
 0x2e0   : > { %v1257_v5 = vrot.slane %v1097_v57, %v5351_v32  ;;  %v2018_v26 = vrot.slane %v4626_v14, %v5351_v32  ;;  %v1301_v8 = vcombine.high %v1093_v0, %v5349_v27  ;;  %v1308_v9 = vrot.slane %v1093_v0, %v5351_v32 }
 0x2e1   : > { %v1101_v17 = vpack.i.b16 %v1100_v1, %v1099_v39  ;;  %v1264_v6 = vrot.slane %v1250_v2, %v5351_v32  ;;  %v2019_v19 = vcombine.low %v5382_v7, %v5387_v11  ;;  %v4627_v21 = vcombine.high %v5382_v7, %v5387_v11 }
 0x2e2   : > { %v1265_v10 = vcombine.low %v1242_v63, %v1257_v5  ;;  %v1266_v12 = vcombine.high %v1242_v63, %v1257_v5  ;;  %v1315_v15 = vrot.slane %v1301_v8, %v5351_v32  ;;  %v1164_v48 = vrot.slane %v1150_v51, %v5358_v43 }
 0x2e3   : > { %v1281_v22 = vcombine.low %v1249_v4, %v1264_v6  ;;  %v1282_v59 = vcombine.high %v1249_v4, %v1264_v6  ;;  %v1316_v60 = vcombine.high %v1101_v17, %v5349_v27  ;;  %v1323_v34 = vrot.slane %v1101_v17, %v5351_v32 }
 0x2e4   : > { %v1273_v14 = vrot.slane %v1265_v10, %v5358_v43  ;;  %v1280_v31 = vrot.slane %v1266_v12, %v5358_v43  ;;  %v2026_v36 = vrot.slane %v2019_v19, %v5351_v32  ;;  %v2034_v11 = vrot.slane %v4627_v21, %v5351_v32 }
 0x2e5   : > { %v1289_v38 = vrot.slane %v1281_v22, %v5358_v43  ;;  %v1296_v39 = vrot.slane %v1282_v59, %v5358_v43  ;;  %v1330_v7 = vrot.slane %v1316_v60, %v5351_v32  ;;  %v1331_v25 = vcombine.low %v1308_v9, %v1323_v34 }
 0x2e6   : > { %v1332_v13 = vcombine.high %v1308_v9, %v1323_v34  ;;  %v1467_v44 = vcombine.low %v1273_v14, %v1280_v31  ;;  %v4618_v37 = vcombine.high %v1273_v14, %v1280_v31  ;;  %v4614_v52 = vcombine.high %v5468_v40, %v5476_v42 }
 0x2e7   : > { %v1347_v55 = vcombine.low %v1315_v15, %v1330_v7  ;;  %v1348_v56 = vcombine.high %v1315_v15, %v1330_v7  ;;  %v5538_v57 = vrot.slane %v1331_v25, %v5358_v43  ;;  %v1483_v0 = vcombine.low %v1289_v38, %v1296_v39 }
 0x2e8   : > { %v5541_v63 = vrot.slane %v1332_v13, %v5358_v43  ;;  %v4619_v1 = vcombine.high %v1289_v38, %v1296_v39  ;;  %v5544_v2 = vrot.slane %v1199_v58, %v5358_v43  ;;  %v5547_v4 = vrot.slane %v1200_v61, %v5358_v43 }
 0x2e9   : > { %v5550_v51 = vrot.slane %v1215_v53, %v5358_v43  ;;  %v5553_v5 = vrot.slane %v1216_v3, %v5358_v43  ;;  %v5556_v8 = vrot.slane %v1467_v44, %v5351_v32  ;;  %v5559_v9 = vrot.slane %v4618_v37, %v5351_v32 }
 0x2ea   : > { %v2035_v17 = vcombine.low %v5459_v23, %v2018_v26  ;;  %v2043_v6 = vcombine.low %v2026_v36, %v2034_v11  ;;  %v5563_v58 = vrot.slane %v1347_v55, %v5358_v43  ;;  %v5566_v61 = vrot.slane %v1348_v56, %v5358_v43 }
 0x2eb   : > { %v2053_v53 = vcombine.low %v5394_v16, %v5397_v18  ;;  %v4628_v3 = vcombine.high %v5394_v16, %v5397_v18  ;;  %v5573_v10 = vrot.slane %v1483_v0, %v5351_v32  ;;  %v5576_v12 = vrot.slane %v4619_v1, %v5351_v32 }
 0x2ec   : > { %v1517_v23 = vcombine.low %v5538_v57, %v5541_v63  ;;  %v5581_v26 = vrot.slane %v2043_v6, %v5358_v43  ;;  %v2069_v15 = vcombine.low %v5413_v28, %v5417_v33  ;;  %v4629_v16 = vcombine.high %v5413_v28, %v5417_v33 }
 0x2ed   : > { %v2060_v19 = vrot.slane %v2053_v53, %v5351_v32  ;;  %v2068_v21 = vrot.slane %v4628_v3, %v5351_v32  ;;  %v4620_v18 = vcombine.high %v5538_v57, %v5541_v63  ;;  %v2042_v22 = vrot.slane %v2035_v17, %v5358_v43 }
 0x2ee   : > { %v1935_v59 = vcombine.low %v5462_v24, %v5465_v35  ;;  %v1943_v60 = vcombine.low %v5473_v41, %v5481_v45  ;;  %v2076_v14 = vrot.slane %v2069_v15, %v5351_v32  ;;  %v2084_v31 = vrot.slane %v4629_v16, %v5351_v32 }
 0x2ef   : > { %v2085_v34 = vcombine.low %v2060_v19, %v2068_v21  ;;  %v1976_v28 = vrot.slane %v1969_v47, %v5351_v32  ;;  %v1533_v33 = vcombine.low %v5563_v58, %v5566_v61  ;;  %v1984_v35 = vrot.slane %v4625_v50, %v5351_v32 }
 0x2f0   : > { %v5605_v36 = vrot.slane %v1935_v59, %v5358_v43  ;;  %v5608_v24 = vrot.slane %v1943_v60, %v5358_v43  ;;  %v2051_v41 = vcombine.low %v2042_v22, %v5581_v26  ;;  %v2093_v45 = vcombine.low %v2076_v14, %v2084_v31 }
 0x2f1   : > { %v1985_v47 = vcombine.low %v5484_v46, %v5490_v49  ;;  %v1374_v38 = vrot.slane %v1367_v62, %v5351_v32  ;;  %v1993_v7 = vcombine.low %v1976_v28, %v1984_v35  ;;  %v1382_v11 = vrot.slane %v4614_v52, %v5351_v32 }
 0x2f2   : > { %v1951_v39 = vcombine.low %v5605_v36, %v5608_v24  ;;  %v1383_v29 = vcombine.low %v5498_v54, %v1164_v48  ;;  %v2092_v30 = vrot.slane %v2085_v34, %v5358_v43  ;;  %v2100_v50 = vrot.slane %v2093_v45, %v5358_v43 }
 0x2f3   : > { %v4615_v25 = vcombine.high %v5498_v54, %v1164_v48  ;;  %v1417_v46 = vcombine.low %v5544_v2, %v5547_v4  ;;  %v4621_v40 = vcombine.high %v5563_v58, %v5566_v61  ;;  %v5633_v42 = vrot.slane %v1985_v47, %v5358_v43 }
 0x2f4   : > { %v5636_v49 = vrot.slane %v1993_v7, %v5358_v43  ;;  %v1390_v62 = vrot.slane %v1383_v29, %v5351_v32  ;;  %v2101_v13 = vcombine.low %v2092_v30, %v2100_v50  ;;  %v2118_v44 = vshrl.u32 %v2051_v41, 16 }
 0x2f5   : > { %v2106_v37 = vshrl.u32 %v1951_v39, 16  ;;  %v1398_v52 = vrot.slane %v4615_v25, %v5351_v32  ;;  %v1399_v48 = vcombine.low %v1374_v38, %v1382_v11  ;;  %v4616_v55 = vcombine.high %v5544_v2, %v5547_v4 }
 0x2f6   : > { %v2001_v54 = vcombine.low %v5633_v42, %v5636_v49  ;;  %v1433_v56 = vcombine.low %v5550_v51, %v5553_v5  ;;  %v2117_v57 = vpack.i.b16 %v2101_v13, %v2051_v41  ;;  %v2119_v63 = vshrl.u32 %v2101_v13, 16 }
 0x2f7   : > { %v1407_v0 = vcombine.low %v1390_v62, %v1398_v52  ;;  %v1424_v1 = vrot.slane %v1417_v46, %v5351_v32  ;;  %v1432_v58 = vrot.slane %v4616_v55, %v5351_v32  ;;  %v4617_v4 = vcombine.high %v5550_v51, %v5553_v5 }
 0x2f8   : > { %v2105_v17 = vpack.i.b16 %v2001_v54, %v1951_v39  ;;  %v2107_v6 = vshrl.u32 %v2001_v54, 16  ;;  %v1440_v61 = vrot.slane %v1433_v56, %v5351_v32  ;;  %4882 = vmatprep.subr.msk.bf16.mxu1 %vm2671_vm2, %v2117_v57  ;;  %v2682_v53 = vsel %vm2671_vm2, %v2117_v57, 0 }
 0x2f9   : > { %v2120_v3 = vpack.i.b16 %v2119_v63, %v2118_v44  ;;  %v1414_v2 = vrot.slane %v1407_v0, %v5358_v43  ;;  %v1524_v19 = vrot.slane %v1517_v23, %v5351_v32  ;;  %v1532_v21 = vrot.slane %v4620_v18, %v5351_v32  ;;  %4783 = vmatpush3.bf16.xpose.msra.mxu1 %v2682_v53 }
 0x2fa   : > { %v2102_v15 = vcombine.high %v2092_v30, %v2100_v50  ;;  %v2108_v16 = vpack.i.b16 %v2107_v6, %v2106_v37  ;;  %4883 = vmatprep.subr.msk.bf16.mxu1 %vm2671_vm2, %v2105_v17  ;;  %v1406_v60 = vrot.slane %v1399_v48, %v5358_v43  ;;  %v1448_v14 = vrot.slane %v4617_v4, %v5351_v32 }
 0x2fb   : > { %4884 = vmatprep.subr.msk.bf16.mxu0 %vm2671_vm2, %v2120_v3  ;;  %v2743_v59 = vsel %vm2671_vm2, %v2120_v3, 0  ;;  %v1449_v31 = vcombine.low %v1424_v1, %v1432_v58  ;;  %v2052_v51 = vcombine.high %v2042_v22, %v5581_v26  ;;  %v1499_v5 = vcombine.low %v5556_v8, %v5559_v9 }
 0x2fc   : > { %4791 = vmatpush3.bf16.xpose.msra.mxu0 %v2743_v59  ;;  %v1415_v23 = vcombine.low %v1406_v60, %v1414_v2  ;;  %v1457_v18 = vcombine.low %v1440_v61, %v1448_v14  ;;  %v1507_v34 = vcombine.low %v5573_v10, %v5576_v12  ;;  %v1540_v28 = vrot.slane %v1533_v33, %v5351_v32 }
 0x2fd   : > { %4885 = vmatprep.subr.msk.bf16.mxu0 %vm2671_vm2, %v2108_v16  ;;  %v2679_v35 = vsel %vm2671_vm2, %v2105_v17, 0  ;;  %v1548_v41 = vrot.slane %v4621_v40, %v5351_v32  ;;  %v1549_v45 = vcombine.low %v1524_v19, %v1532_v21  ;;  %v1456_v26 = vrot.slane %v1449_v31, %v5358_v43 }
 0x2fe   : > { %v1464_v22 = vrot.slane %v1457_v18, %v5358_v43  ;;  %v2125_v47 = vshrl.u32 %v2102_v15, 16  ;;  %v1514_v8 = vrot.slane %v1507_v34, %v5358_v43  ;;  %v2123_v9 = vpack.i.b16 %v2102_v15, %v2052_v51  ;;  %v5697_v15 = vpop.f32.mrf.mxu0 }
 0x2ff   : > { %v1506_v38 = vrot.slane %v1499_v5, %v5358_v43  ;;  %v1557_v39 = vcombine.low %v1540_v28, %v1548_v41  ;;  %v2740_v10 = vsel %vm2671_vm2, %v2108_v16, 0  ;;  %v1570_v33 = vshrl.u32 %v1415_v23, 16 }
 0x300   : > { %v1465_v12 = vcombine.low %v1456_v26, %v1464_v22  ;;  %v2124_v7 = vshrl.u32 %v2052_v51, 16  ;;  %v1466_v11 = vcombine.high %v1456_v26, %v1464_v22  ;;  %v1556_v30 = vrot.slane %v1549_v45, %v5358_v43  ;;  %v5699_v16 = vpop.f32.mrf.mxu0 }
 0x301   : > { %4785 = vmatpush3.bf16.xpose.msra.mxu1 %v2679_v35  ;;  %v1515_v29 = vcombine.low %v1506_v38, %v1514_v8  ;;  %v1564_v50 = vrot.slane %v1557_v39, %v5358_v43  ;;  %v2002_v62 = vcombine.high %v5633_v42, %v5636_v49  ;;  %v1416_v13 = vcombine.high %v1406_v60, %v1414_v2 }
 0x302   : > { %4886 = vmatprep.subr.msk.bf16.mxu1 %vm2671_vm2, %v2123_v9  ;;  %v1569_v25 = vpack.i.b16 %v1465_v12, %v1415_v23  ;;  %v1571_v46 = vshrl.u32 %v1465_v12, 16  ;;  %v2126_v40 = vpack.i.b16 %v2125_v47, %v2124_v7  ;;  %v1952_v52 = vcombine.high %v5605_v36, %v5608_v24  ;;  %v5702_v60 = vpop.f32.mrf.mxu0 }
 0x303   : > { %v1565_v44 = vcombine.low %v1556_v30, %v1564_v50  ;;  %v1582_v48 = vshrl.u32 %v1515_v29, 16  ;;  %v1577_v56 = vshrl.u32 %v1466_v11, 16  ;;  %v2113_v57 = vshrl.u32 %v2002_v62, 16 }
 0x304   : > { %4793 = vmatpush3.bf16.xpose.msra.mxu0 %v2740_v10  ;;  %4786 = vmatprep.mubr.msk.bf16.mxu1 %vm2671_vm2, %v1569_v25  ;;  %v1572_v37 = vpack.i.b16 %v1571_v46, %v1570_v33  ;;  %v1575_v63 = vpack.i.b16 %v1466_v11, %v1416_v13  ;;  %v1576_v49 = vshrl.u32 %v1416_v13, 16  ;;  %v2804_v0 = vsel %vm2671_vm2, %v2123_v9, 0  ;;  %v5704_v14 = vpop.f32.mrf.mxu0 }
 0x305   : > { %4888 = vmatprep.subr.msk.bf16.mxu0 %vm2671_vm2, %v2126_v40  ;;  %v1581_v54 = vpack.i.b16 %v1565_v44, %v1515_v29  ;;  %v1583_v55 = vshrl.u32 %v1565_v44, 16  ;;  %v2111_v1 = vpack.i.b16 %v2002_v62, %v1952_v52  ;;  %v2112_v17 = vshrl.u32 %v1952_v52, 16 }
 0x306   : > { %4794 = vmatprep.mubr.msk.bf16.mxu0 %vm2671_vm2, %v1572_v37  ;;  %v1578_v36 = vpack.i.b16 %v1577_v56, %v1576_v49  ;;  %v2865_v24 = vsel %vm2671_vm2, %v2126_v40, 0  ;;  %v1566_v58 = vcombine.high %v1556_v30, %v1564_v50  ;;  %v1516_v53 = vcombine.high %v1506_v38, %v1514_v8 }
 0x307   : > { %v1584_v42 = vpack.i.b16 %v1583_v55, %v1582_v48  ;;  %v2114_v6 = vpack.i.b16 %v2113_v57, %v2112_v17  ;;  %v2801_v61 = vsel %vm2671_vm2, %v2111_v1, 0  ;;  %v2917_v59 = vand.u32 127, %v1107_v20 }
 0x308   : > { %4787 = vmatmul.mubr.msk.bf16.vlgmr.msra.gmra.mxu1 %vm2671_vm2, %v1581_v54  ;;  %v1589_v2 = vshrl.u32 %v1566_v58, 16  ;;  %v1587_v4 = vpack.i.b16 %v1566_v58, %v1516_v53  ;;  %v1588_v19 = vshrl.u32 %v1516_v53, 16  ;;  %v5788_v58 = vpack.c.bf16 %v5702_v60, %v5697_v15 }
 0x309   : > { %4799 = vmatpush3.bf16.xpose.msra.mxu1 %v2804_v0  ;;  %4802 = vmatprep.mubr.msk.bf16.mxu1 %vm2671_vm2, %v1575_v63  ;;  %v2862_v3 = vsel %vm2671_vm2, %v2114_v6, 0  ;;  %vm2918_vm3 = vcmp.lt.s32.totalorder %v2917_v59, 17 }
 0x30a   : > { %4887 = vmatprep.subr.msk.bf16.mxu1 %vm2671_vm2, %v2111_v1  ;;  %v1590_v21 = vpack.i.b16 %v1589_v2, %v1588_v19 }
 0x30b   : > { %4795 = vmatmul.mubr.msk.bf16.vlgmr.msra.gmra.mxu0 %vm2671_vm2, %v1584_v42 }
 0x30c   : > { %4807 = vmatpush3.bf16.xpose.msra.mxu0 %v2865_v24  ;;  %4810 = vmatprep.mubr.msk.bf16.mxu0 %vm2671_vm2, %v1578_v36 }
 0x30d   : > { %4889 = vmatprep.subr.msk.bf16.mxu0 %vm2671_vm2, %v2114_v6 }
 0x311   : > { %4801 = vmatpush3.bf16.xpose.msra.mxu1 %v2801_v61  ;;  %v5798_v61 = vpack.c.bf16 %v5704_v14, %v5699_v16 }
 0x314   : > { %4809 = vmatpush3.bf16.xpose.msra.mxu0 %v2862_v3 }
 0x318   : > { %4803 = vmatmul.mubr.msk.bf16.vlgmr.msra.gmra.mxu1 %vm2671_vm2, %v1587_v4 }
 0x31b   : > { %4811 = vmatmul.mubr.msk.bf16.vlgmr.msra.gmra.mxu0 %vm2671_vm2, %v1590_v21 }
 0x3c8   : > { %v4788_v31 = vpop.f32.mrf.mxu1 }
 0x3c9   : > { %v5707_v51 = vsel %vm2918_vm3, %v4788_v31, -1e+30 }
 0x3ca   : > { %v2718_v5 = vpop.f32.mrf.mxu1  ;;  %v2941_v18 = vsel %vm772_vm1, %v5707_v51, -inf }
 0x3cb   : > { %v4796_v23 = vpop.f32.mrf.mxu0  ;;  %v5712_v34 = vsel %vm2918_vm3, %v2718_v5, -1e+30  ;;  %2942 = vmax.xlane.f32.xlu0 %v2941_v18 }
 0x3cc   : > { %v4789_v28 = vpop.f32.mrf.mxu1  ;;  %v2935_v45 = vsel %vm772_vm1, %v5712_v34, -inf  ;;  %v5722_v22 = vsel %vm2918_vm3, %v4796_v23, -1e+30 }
 0x3cd   : > { %v2779_v20 = vpop.f32.mrf.mxu0  ;;  %v5715_v35 = vsel %vm2918_vm3, %v4789_v28, -1e+30  ;;  %v2953_v38 = vsel %vm772_vm1, %v5722_v22, -inf }
 0x3ce   : > { %v2721_v41 = vpop.f32.mrf.mxu1  ;;  %v2944_v26 = vsel %vm772_vm1, %v5715_v35, -inf  ;;  %v5732_v39 = vsel %vm2918_vm3, %v2779_v20, -1e+30 }
 0x3cf   : > { %v5725_v47 = vsel %vm2918_vm3, %v2721_v41, -1e+30  ;;  %2936 = vmax.xlane.f32.xlu0 %v2935_v45  ;;  %2945 = vmax.xlane.f32.xlu1 %v2944_v26  ;;  %v4797_v8 = vpop.f32.mrf.mxu0  ;;  %v2947_v33 = vsel %vm772_vm1, %v5732_v39, -inf }
 0x3d0   : > { %v2938_v9 = vsel %vm772_vm1, %v5725_v47, -inf  ;;  %v5735_v10 = vsel %vm2918_vm3, %v4797_v8, -1e+30 }
 0x3d1   : > { %v2782_v12 = vpop.f32.mrf.mxu0  ;;  %v2956_v7 = vsel %vm772_vm1, %v5735_v10, -inf }
 0x3d2   : > { %v5742_v11 = vsel %vm2918_vm3, %v2782_v12, -1e+30 }
 0x3d3   : > { %2939 = vmax.xlane.f32.xlu1 %v2938_v9  ;;  %2954 = vmax.xlane.f32.xlu0 %v2953_v38  ;;  %v2950_v25 = vsel %vm772_vm1, %v5742_v11, -inf }
 0x3d7   : > { %2948 = vmax.xlane.f32.xlu0 %v2947_v33  ;;  %2957 = vmax.xlane.f32.xlu1 %v2956_v7 }
 0x3d8   : > { %v4804_v29 = vpop.f32.mrf.mxu1 }
 0x3d9   : > { %v5747_v46 = vsel %vm2918_vm3, %v4804_v29, -1e+30 }
 0x3da   : > { %v2840_v30 = vpop.f32.mrf.mxu1  ;;  %v2965_v54 = vsel %vm772_vm1, %v5747_v46, -inf }
 0x3db   : > { %v4812_v50 = vpop.f32.mrf.mxu0  ;;  %2951 = vmax.xlane.f32.xlu0 %v2950_v25  ;;  %v5757_v48 = vsel %vm2918_vm3, %v2840_v30, -1e+30 }
 0x3dc   : > { %v4805_v40 = vpop.f32.mrf.mxu1  ;;  %v2959_v63 = vsel %vm772_vm1, %v5757_v48, -inf  ;;  %v5777_v17 = vsel %vm2918_vm3, %v4812_v50, -1e+30 }
 0x3dd   : > { %v2901_v62 = vpop.f32.mrf.mxu0  ;;  %v5750_v13 = vsel %vm2918_vm3, %v4805_v40, -1e+30  ;;  %v2977_v6 = vsel %vm772_vm1, %v5777_v17, -inf }
 0x3de   : > { %v2843_v44 = vpop.f32.mrf.mxu1  ;;  %v2968_v52 = vsel %vm772_vm1, %v5750_v13, -inf  ;;  %v5767_v42 = vsel %vm2918_vm3, %v2901_v62, -1e+30 }
 0x3df   : > { %v4813_v37 = vpop.f32.mrf.mxu0  ;;  %v5760_v55 = vsel %vm2918_vm3, %v2843_v44, -1e+30  ;;  %2969 = vmax.xlane.f32.xlu1 %v2968_v52  ;;  %2966 = vmax.xlane.f32.xlu0 %v2965_v54  ;;  %v2971_v1 = vsel %vm772_vm1, %v5767_v42, -inf }
 0x3e0   : > { %v2962_v57 = vsel %vm772_vm1, %v5760_v55, -inf  ;;  %v5780_v36 = vsel %vm2918_vm3, %v4813_v37, -1e+30 }
 0x3e1   : > { %v2904_v56 = vpop.f32.mrf.mxu0  ;;  %v2980_v24 = vsel %vm772_vm1, %v5780_v36, -inf }
 0x3e2   : > { %v5770_v49 = vsel %vm2918_vm3, %v2904_v56, -1e+30 }
 0x3e3   : > { %2963 = vmax.xlane.f32.xlu1 %v2962_v57  ;;  %2960 = vmax.xlane.f32.xlu0 %v2959_v63  ;;  %v2974_v0 = vsel %vm772_vm1, %v5770_v49, -inf }
 0x3e7   : > { %2975 = vmax.xlane.f32.xlu1 %v2974_v0  ;;  %2972 = vmax.xlane.f32.xlu0 %v2971_v1 }
 0x3eb   : > { %2981 = vmax.xlane.f32.xlu1 %v2980_v24  ;;  %2978 = vmax.xlane.f32.xlu0 %v2977_v6 }
 0x3fc   : > { %2137 = vrot.lane.b32.xlu1 %v5788_v58, %s5097_s30 }
 0x400   : > { %2141 = vrot.lane.b32.xlu1 %v5788_v58, %s5099_s27 }
 0x401   : > { %2133 = vrot.lane.b32.xlu0 %v5788_v58, %s5098_s19 }
 0x404   : > { %2131 = vrot.lane.b32.xlu1 %v5798_v61, %s5098_s19  ;;  %s6251_s19 = sld [smem:[#allocation16_spill]] (!%p4683_p8) }
 0x405   : > { %2135 = vrot.lane.b32.xlu0 %v5798_v61, %s5097_s30 }
 0x408   : > { %2139 = vrot.lane.b32.xlu1 %v5798_v61, %s5099_s27 }
 0x454   : > { %v2943_v53 = vpop.xlane.xlu0 %2942 }
 0x455   : > { %v2985_v3 = vsub.f32 %v5707_v51, %v2943_v53 }
 0x457   : > { %v3003_v2 = vmul.f32 1.442695, %v2985_v3 }
 0x458   : > { %v2937_v4 = vpop.xlane.xlu0 %2936  ;;  %v2946_v19 = vpop.xlane.xlu1 %2945 }
 0x459   : > { %4965 = vpow2.f32 %v3003_v2  ;;  %v2983_v21 = vsub.f32 %v5712_v34, %v2937_v4  ;;  %v2986_v31 = vsub.f32 %v5715_v35, %v2946_v19 }
 0x45b   : > { %v2999_v15 = vmul.f32 1.442695, %v2983_v21  ;;  %v3005_v41 = vmul.f32 1.442695, %v2986_v31 }
 0x45c   : > { %v2940_v16 = vpop.xlane.xlu1 %2939  ;;  %v2955_v59 = vpop.xlane.xlu0 %2954 }
 0x45d   : > { %4967 = vpow2.f32 %v2999_v15  ;;  %v2989_v60 = vsub.f32 %v5722_v22, %v2955_v59  ;;  %v2984_v34 = vsub.f32 %v5725_v47, %v2940_v16  ;;  %v2163_v15 = vshrl.u32 %v5788_v58, 16 }
 0x45f   : > { %v3011_v14 = vmul.f32 1.442695, %v2989_v60  ;;  %v3001_v8 = vmul.f32 1.442695, %v2984_v34 }
 0x460   : > { %v2949_v5 = vpop.xlane.xlu0 %2948  ;;  %v2958_v23 = vpop.xlane.xlu1 %2957 }
 0x461   : > { %v2987_v18 = vsub.f32 %v5732_v39, %v2949_v5  ;;  %v2990_v51 = vsub.f32 %v5735_v10, %v2958_v23  ;;  %4969 = vpow2.f32 %v3011_v14 }
 0x463   : > { %v3007_v28 = vmul.f32 1.442695, %v2987_v18  ;;  %v3013_v20 = vmul.f32 1.442695, %v2990_v51 }
 0x464   : > { %v2952_v45 = vpop.xlane.xlu0 %2951 }
 0x465   : > { %4971 = vpow2.f32 %v3007_v28  ;;  %v2988_v22 = vsub.f32 %v5742_v11, %v2952_v45 }
 0x466   : > { %v5813_v26 = vpop.eup %4965  ;;  %4973 = vpow2.f32 %v3013_v20  ;;  %v2147_v20 = vshrl.u32 %v5798_v61, 16 }
 0x467   : > { %v3037_v35 = vsel %vm772_vm1, %v5813_v26, 0.0  ;;  %4975 = vpow2.f32 %v3005_v41  ;;  %v3009_v12 = vmul.f32 1.442695, %v2988_v22 }
 0x468   : > { %v2970_v9 = vpop.xlane.xlu1 %2969  ;;  %v2967_v38 = vpop.xlane.xlu0 %2966  ;;  %3038 = vadd.xlane.f32.xlu1 %v3037_v35  ;;  %4977 = vpow2.f32 %v3001_v8 }
 0x469   : > { %v2994_v39 = vsub.f32 %v5750_v13, %v2970_v9  ;;  %v2993_v10 = vsub.f32 %v5747_v46, %v2967_v38 }
 0x46a   : > { %v5820_v47 = vpop.eup %4967 }
 0x46b   : > { %v3021_v33 = vmul.f32 1.442695, %v2994_v39  ;;  %v3019_v7 = vmul.f32 1.442695, %v2993_v10  ;;  %v3031_v11 = vsel %vm772_vm1, %v5820_v47, 0.0 }
 0x46c   : > { %v2964_v29 = vpop.xlane.xlu1 %2963  ;;  %v2961_v30 = vpop.xlane.xlu0 %2960  ;;  %3032 = vadd.xlane.f32.xlu1 %v3031_v11 }
 0x46d   : > { %4979 = vpow2.f32 %v3021_v33  ;;  %v2992_v50 = vsub.f32 %v5760_v55, %v2964_v29  ;;  %v2991_v40 = vsub.f32 %v5757_v48, %v2961_v30 }
 0x46e   : > { %4981 = vpow2.f32 %v3009_v12  ;;  %v5825_v25 = vpop.eup %4969 }
 0x46f   : > { %4983 = vpow2.f32 %v3019_v7  ;;  %v3017_v46 = vmul.f32 1.442695, %v2992_v50  ;;  %v3049_v44 = vsel %vm772_vm1, %v5825_v25, 0.0  ;;  %v3015_v55 = vmul.f32 1.442695, %v2991_v40 }
 0x470   : > { %v2976_v62 = vpop.xlane.xlu1 %2975  ;;  %v2973_v13 = vpop.xlane.xlu0 %2972  ;;  %3050 = vadd.xlane.f32.xlu0 %v3049_v44 }
 0x471   : > { %4985 = vpow2.f32 %v3017_v46  ;;  %v2996_v52 = vsub.f32 %v5770_v49, %v2976_v62  ;;  %v2995_v56 = vsub.f32 %v5767_v42, %v2973_v13 }
 0x472   : > { %v5830_v37 = vpop.eup %4971  ;;  %4987 = vpow2.f32 %v3015_v55 }
 0x473   : > { %v5833_v54 = vpop.eup %4973  ;;  %v3043_v57 = vsel %vm772_vm1, %v5830_v37, 0.0  ;;  %v3025_v49 = vmul.f32 1.442695, %v2996_v52  ;;  %v3023_v53 = vmul.f32 1.442695, %v2995_v56 }
 0x474   : > { %v2982_v48 = vpop.xlane.xlu1 %2981  ;;  %v2979_v63 = vpop.xlane.xlu0 %2978  ;;  %v3052_v0 = vsel %vm772_vm1, %v5833_v54, 0.0  ;;  %3044 = vadd.xlane.f32.xlu0 %v3043_v57 }
 0x475   : > { %v5840_v1 = vpop.eup %4975  ;;  %v2998_v24 = vsub.f32 %v5780_v36, %v2982_v48  ;;  %v2997_v6 = vsub.f32 %v5777_v17, %v2979_v63  ;;  %3053 = vadd.xlane.f32.xlu1 %v3052_v0  ;;  %4989 = vpow2.f32 %v3025_v49 }
 0x476   : > { %v3040_v4 = vsel %vm772_vm1, %v5840_v1, 0.0  ;;  %v5846_v19 = vpop.eup %4977  ;;  %4991 = vpow2.f32 %v3023_v53 }
 0x477   : > { %v3029_v42 = vmul.f32 1.442695, %v2998_v24  ;;  %v3027_v21 = vmul.f32 1.442695, %v2997_v6 }
 0x478   : > { %v2138_v3 = vpop.permute.xlu1 %2137  ;;  %v2134_v2 = vpop.permute.xlu0 %2133  ;;  %3041 = vadd.xlane.f32.xlu0 %v3040_v4 }
 0x479   : > { %v2161_v36 = vpack.i.b16 %v2134_v2, %v5788_v58  ;;  %v2164_v16 = vshrl.u32 %v2134_v2, 16  ;;  %4993 = vpow2.f32 %v3029_v42  ;;  %v3034_v58 = vsel %vm772_vm1, %v5846_v19, 0.0 }
 0x47a   : > { %v5850_v17 = vpop.eup %4979  ;;  %4995 = vpow2.f32 %v3027_v21  ;;  %v2171_v34 = vshrl.u32 %v2138_v3, 16 }
 0x47b   : > { %v5852_v59 = vpop.eup %4981  ;;  %v2165_v60 = vpack.i.b16 %v2164_v16, %v2163_v15  ;;  %v3064_v14 = vsel %vm772_vm1, %v5850_v17, 0.0  ;;  %v2307_v5 = vcombine.high %v2161_v36, %v5349_v27  ;;  %v2314_v45 = vrot.slane %v2161_v36, %v5351_v32 }
 0x47c   : > { %v5856_v31 = vpop.eup %4983  ;;  %v2142_v23 = vpop.permute.xlu1 %2141  ;;  %3065 = vadd.xlane.f32.xlu1 %v3064_v14  ;;  %3035 = vadd.xlane.f32.xlu0 %v3034_v58  ;;  %v3046_v35 = vsel %vm772_vm1, %v5852_v59, 0.0 }
 0x47d   : > { %v2373_v18 = vcombine.high %v2165_v60, %v5349_v27  ;;  %v2169_v51 = vpack.i.b16 %v2142_v23, %v2138_v3  ;;  %v5862_v28 = vpop.permute.xlu0 %2135  ;;  %v2172_v22 = vshrl.u32 %v2142_v23, 16  ;;  %v3061_v39 = vsel %vm772_vm1, %v5856_v31, 0.0 }
 0x47e   : > { %v5865_v41 = vpop.eup %4985  ;;  %v2321_v10 = vrot.slane %v2307_v5, %v5351_v32  ;;  %v2380_v12 = vrot.slane %v2165_v60, %v5351_v32  ;;  %v2155_v7 = vshrl.u32 %v5862_v28, 16 }
 0x47f   : > { %v2322_v8 = vcombine.high %v2169_v51, %v5349_v27  ;;  %v2329_v9 = vrot.slane %v2169_v51, %v5351_v32  ;;  %v3058_v38 = vsel %vm772_vm1, %v5865_v41, 0.0  ;;  %v2173_v33 = vpack.i.b16 %v2172_v22, %v2171_v34  ;;  %v5886_v48 = vpop.eup %4987 }
 0x480   : > { %3059 = vadd.xlane.f32.xlu1 %v3058_v38  ;;  %v2132_v11 = vpop.permute.xlu1 %2131  ;;  %v2387_v29 = vrot.slane %v2373_v18, %v5351_v32  ;;  %3047 = vadd.xlane.f32.xlu0 %v3046_v35  ;;  %v3055_v5 = vsel %vm772_vm1, %v5886_v48, 0.0 }
 0x481   : > { %v2336_v30 = vrot.slane %v2322_v8, %v5351_v32  ;;  %v2337_v50 = vcombine.low %v2314_v45, %v2329_v9  ;;  %v2338_v46 = vcombine.high %v2314_v45, %v2329_v9  ;;  %v2388_v40 = vcombine.high %v2173_v33, %v5349_v27 }
 0x482   : > { %v2395_v62 = vrot.slane %v2173_v33, %v5351_v32  ;;  %v2145_v13 = vpack.i.b16 %v2132_v11, %v5798_v61  ;;  %v2148_v44 = vshrl.u32 %v2132_v11, 16  ;;  %v5897_v15 = vpop.eup %4989 }
 0x483   : > { %v2345_v52 = vrot.slane %v2337_v50, %v5358_v43  ;;  %v2352_v55 = vrot.slane %v2338_v46, %v5358_v43  ;;  %v2353_v56 = vcombine.low %v2321_v10, %v2336_v30  ;;  %v2354_v57 = vcombine.high %v2321_v10, %v2336_v30  ;;  %v5907_v23 = vpop.eup %4991 }
 0x484   : > { %v2402_v63 = vrot.slane %v2388_v40, %v5351_v32  ;;  %v2403_v0 = vcombine.low %v2380_v12, %v2395_v62  ;;  %v2404_v24 = vcombine.high %v2380_v12, %v2395_v62  ;;  %v2149_v6 = vpack.i.b16 %v2148_v44, %v2147_v20  ;;  %3062 = vadd.xlane.f32.xlu0 %v3061_v39  ;;  %v2140_v14 = vpop.permute.xlu1 %2139 }
 0x485   : > { %v2361_v49 = vrot.slane %v2353_v56, %v5358_v43  ;;  %v2368_v53 = vrot.slane %v2354_v57, %v5358_v43  ;;  %v2539_v42 = vcombine.low %v2345_v52, %v2352_v55  ;;  %v4634_v61 = vcombine.high %v2345_v52, %v2352_v55 }
 0x486   : > { %v5892_v3 = vrot.slane %v2403_v0, %v5358_v43  ;;  %v5895_v2 = vrot.slane %v2404_v24, %v5358_v43  ;;  %v2419_v4 = vcombine.low %v2387_v29, %v2402_v63  ;;  %v2420_v21 = vcombine.high %v2387_v29, %v2402_v63  ;;  %v5917_v34 = vpop.eup %4993 }
 0x487   : > { %v5900_v36 = vrot.slane %v2539_v42, %v5351_v32  ;;  %v5903_v16 = vrot.slane %v4634_v61, %v5351_v32  ;;  %v2555_v60 = vcombine.low %v2361_v49, %v2368_v53  ;;  %v4635_v51 = vcombine.high %v2361_v49, %v2368_v53  ;;  %v5924_v9 = vpop.eup %4995 }
 0x488   : > { %v5910_v58 = vrot.slane %v2419_v4, %v5358_v43  ;;  %v5913_v18 = vrot.slane %v2420_v21, %v5358_v43  ;;  %v2589_v20 = vcombine.low %v5892_v3, %v5895_v2  ;;  %v4636_v45 = vcombine.high %v5892_v3, %v5895_v2  ;;  %3056 = vadd.xlane.f32.xlu0 %v3055_v5 }
 0x489   : > { %v2175_v22 = vcombine.high %v2145_v13, %v5349_v27  ;;  %v2182_v35 = vrot.slane %v2145_v13, %v5351_v32  ;;  %v2241_v8 = vcombine.high %v2149_v6, %v5349_v27  ;;  %v2248_v39 = vrot.slane %v2149_v6, %v5351_v32 }
 0x48a   : > { %v2605_v38 = vcombine.low %v5910_v58, %v5913_v18  ;;  %v3070_v10 = vsel %vm772_vm1, %v5897_v15, 0.0  ;;  %v2153_v12 = vpack.i.b16 %v2140_v14, %v5862_v28  ;;  %v4637_v33 = vcombine.high %v5910_v58, %v5913_v18 }
 0x48b   : > { %v2189_v11 = vrot.slane %v2175_v22, %v5351_v32  ;;  %v2255_v29 = vrot.slane %v2241_v8, %v5351_v32  ;;  %3071 = vadd.xlane.f32.xlu1 %v3070_v10  ;;  %v2156_v30 = vshrl.u32 %v2140_v14, 16  ;;  %v3076_v40 = vsel %vm772_vm1, %v5917_v34, 0.0 }
 0x48c   : > { %v2190_v50 = vcombine.high %v2153_v12, %v5349_v27  ;;  %v2197_v46 = vrot.slane %v2153_v12, %v5351_v32  ;;  %v3067_v62 = vsel %vm772_vm1, %v5907_v23, 0.0  ;;  %v3073_v13 = vsel %vm772_vm1, %v5924_v9, 0.0 }
 0x48d   : > { %v2157_v28 = vpack.i.b16 %v2156_v30, %v2155_v7  ;;  %3068 = vadd.xlane.f32.xlu0 %v3067_v62  ;;  %v2562_v44 = vrot.slane %v2555_v60, %v5351_v32  ;;  %v2570_v52 = vrot.slane %v4635_v51, %v5351_v32  ;;  %v2571_v63 = vcombine.low %v5900_v36, %v5903_v16 }
 0x48e   : > { %v2204_v55 = vrot.slane %v2190_v50, %v5351_v32  ;;  %v2205_v56 = vcombine.low %v2182_v35, %v2197_v46  ;;  %v2206_v57 = vcombine.high %v2182_v35, %v2197_v46  ;;  %v2596_v6 = vrot.slane %v2589_v20, %v5351_v32 }
 0x48f   : > { %v2256_v0 = vcombine.high %v2157_v28, %v5349_v27  ;;  %v2263_v24 = vrot.slane %v2157_v28, %v5351_v32  ;;  %3077 = vadd.xlane.f32.xlu1 %v3076_v40  ;;  %v2579_v7 = vcombine.low %v2562_v44, %v2570_v52  ;;  %v2578_v30 = vrot.slane %v2571_v63, %v5358_v43 }
 0x490   : > { %v2213_v49 = vrot.slane %v2205_v56, %v5358_v43  ;;  %v2220_v53 = vrot.slane %v2206_v57, %v5358_v43  ;;  %v2221_v42 = vcombine.low %v2189_v11, %v2204_v55  ;;  %v2222_v61 = vcombine.high %v2189_v11, %v2204_v55 }
 0x491   : > { %v2270_v3 = vrot.slane %v2256_v0, %v5351_v32  ;;  %v2271_v2 = vcombine.low %v2248_v39, %v2263_v24  ;;  %v2272_v4 = vcombine.high %v2248_v39, %v2263_v24  ;;  %3074 = vadd.xlane.f32.xlu0 %v3073_v13  ;;  %v2586_v21 = vrot.slane %v2579_v7, %v5358_v43 }
 0x492   : > { %v2229_v36 = vrot.slane %v2221_v42, %v5358_v43  ;;  %v2236_v16 = vrot.slane %v2222_v61, %v5358_v43  ;;  %v2439_v60 = vcombine.low %v2213_v49, %v2220_v53  ;;  %v4630_v14 = vcombine.high %v2213_v49, %v2220_v53 }
 0x493   : > { %v2279_v5 = vrot.slane %v2271_v2, %v5358_v43  ;;  %v2286_v58 = vrot.slane %v2272_v4, %v5358_v43  ;;  %v2287_v18 = vcombine.low %v2255_v29, %v2270_v3  ;;  %v2288_v51 = vcombine.high %v2255_v29, %v2270_v3 }
 0x494   : > { %v2446_v20 = vrot.slane %v2439_v60, %v5351_v32  ;;  %v2454_v22 = vrot.slane %v4630_v14, %v5351_v32  ;;  %v2455_v35 = vcombine.low %v2229_v36, %v2236_v16  ;;  %v4631_v8 = vcombine.high %v2229_v36, %v2236_v16 }
 0x495   : > { %v2295_v39 = vrot.slane %v2287_v18, %v5358_v43  ;;  %v2302_v10 = vrot.slane %v2288_v51, %v5358_v43  ;;  %v2489_v12 = vcombine.low %v2279_v5, %v2286_v58  ;;  %v4632_v11 = vcombine.high %v2279_v5, %v2286_v58 }
 0x496   : > { %v2604_v50 = vrot.slane %v4636_v45, %v5351_v32  ;;  %v2612_v46 = vrot.slane %v2605_v38, %v5351_v32  ;;  %v2620_v29 = vrot.slane %v4637_v33, %v5351_v32  ;;  %v2462_v28 = vrot.slane %v2455_v35, %v5351_v32 }
 0x497   : > { %v2505_v40 = vcombine.low %v2295_v39, %v2302_v10  ;;  %v4633_v62 = vcombine.high %v2295_v39, %v2302_v10  ;;  %v2470_v13 = vrot.slane %v4631_v8, %v5351_v32  ;;  %v2587_v44 = vcombine.low %v2578_v30, %v2586_v21 }
 0x498   : > { %v2621_v52 = vcombine.low %v2596_v6, %v2604_v50  ;;  %v2629_v55 = vcombine.low %v2612_v46, %v2620_v29  ;;  %v2471_v56 = vcombine.low %v2446_v20, %v2454_v22  ;;  %v2496_v0 = vrot.slane %v2489_v12, %v5351_v32 }
 0x499   : > { %v2479_v57 = vcombine.low %v2462_v28, %v2470_v13  ;;  %v2504_v63 = vrot.slane %v4632_v11, %v5351_v32  ;;  %v2512_v45 = vrot.slane %v2505_v40, %v5351_v32  ;;  %v2520_v24 = vrot.slane %v4633_v62, %v5351_v32 }
 0x49a   : > { %v2628_v38 = vrot.slane %v2621_v52, %v5358_v43  ;;  %v2636_v33 = vrot.slane %v2629_v55, %v5358_v43  ;;  %v2478_v7 = vrot.slane %v2471_v56, %v5358_v43  ;;  %v2659_v61 = vshrl.u32 %v2587_v44, 16 }
 0x49b   : > { %v2486_v49 = vrot.slane %v2479_v57, %v5358_v43  ;;  %v2521_v6 = vcombine.low %v2496_v0, %v2504_v63  ;;  %v2529_v42 = vcombine.low %v2512_v45, %v2520_v24  ;;  %v2588_v18 = vcombine.high %v2578_v30, %v2586_v21 }
 0x49c   : > { %v2637_v53 = vcombine.low %v2628_v38, %v2636_v33  ;;  %v2638_v2 = vcombine.high %v2628_v38, %v2636_v33 }
 0x49d   : > { %v2487_v3 = vcombine.low %v2478_v7, %v2486_v49  ;;  %v2488_v4 = vcombine.high %v2478_v7, %v2486_v49  ;;  %v2528_v60 = vrot.slane %v2521_v6, %v5358_v43  ;;  %v2536_v14 = vrot.slane %v2529_v42, %v5358_v43 }
 0x49e   : > { %v2657_v36 = vpack.i.b16 %v2637_v53, %v2587_v44  ;;  %v2660_v16 = vshrl.u32 %v2637_v53, 16  ;;  %v2668_v22 = vshrl.u32 %v2638_v2, 16  ;;  %v2665_v50 = vpack.i.b16 %v2638_v2, %v2588_v18 }
 0x49f   : > { %v2537_v58 = vcombine.low %v2528_v60, %v2536_v14  ;;  %v2538_v51 = vcombine.high %v2528_v60, %v2536_v14  ;;  %v2643_v20 = vshrl.u32 %v2487_v3, 16  ;;  %v2651_v35 = vshrl.u32 %v2488_v4, 16 }
 0x4a0   : > { %4814 = vmatprep.subr.bf16.mxu1 %v2657_v36  ;;  %v2661_v5 = vpack.i.b16 %v2660_v16, %v2659_v61  ;;  %v2667_v46 = vshrl.u32 %v2588_v18, 16 }
 0x4a1   : > { %4815 = vmatpush3.bf16.msra.mxu1 %v2657_v36  ;;  %v2641_v8 = vpack.i.b16 %v2537_v58, %v2487_v3  ;;  %v2644_v39 = vshrl.u32 %v2537_v58, 16  ;;  %v5980_v10 = vpack.i.b16 %v2538_v51, %v2488_v4  ;;  %v2652_v12 = vshrl.u32 %v2538_v51, 16 }
 0x4a2   : > { %4822 = vmatprep.subr.bf16.mxu0 %v2661_v5  ;;  %v5984_v21 = vpack.i.b16 %v2668_v22, %v2667_v46 }
 0x4a3   : > { %4823 = vmatpush3.bf16.msra.mxu0 %v2661_v5  ;;  %4816 = vmatprep.subr.bf16.mxu1 %v2641_v8  ;;  %v2645_v11 = vpack.i.b16 %v2644_v39, %v2643_v20  ;;  %v5982_v29 = vpack.i.b16 %v2652_v12, %v2651_v35 }
 0x4a5   : > { %4817 = vmatpush3.bf16.msra.mxu1 %v2641_v8  ;;  %4824 = vmatprep.subr.bf16.mxu0 %v2645_v11 }
 0x4a6   : > { %4830 = vmatprep.subr.bf16.mxu1 %v2665_v50 }
 0x4a7   : > { %4825 = vmatpush3.bf16.msra.mxu0 %v2645_v11 }
 0x4a8   : > { %4838 = vmatprep.subr.bf16.mxu0 %v5984_v21 }
 0x4f1   : > { %v3039_v30 = vpop.xlane.xlu1 %3038 }
 0x4f5   : > { %v3033_v28 = vpop.xlane.xlu1 %3032 }
 0x4f9   : > { %v3051_v40 = vpop.xlane.xlu0 %3050 }
 0x4fd   : > { %v3045_v62 = vpop.xlane.xlu0 %3044 }
 0x4fe   : > { %v3054_v44 = vpop.xlane.xlu1 %3053 }
 0x501   : > { %v3042_v13 = vpop.xlane.xlu0 %3041 }
 0x502   : > { %4997 = vrcp.f32 %v3042_v13 }
 0x503   : > { %4999 = vrcp.f32 %v3033_v28 }
 0x504   : > { %5001 = vrcp.f32 %v3039_v30 }
 0x505   : > { %v3036_v52 = vpop.xlane.xlu0 %3035  ;;  %v3066_v55 = vpop.xlane.xlu1 %3065 }
 0x506   : > { %5003 = vrcp.f32 %v3036_v52 }
 0x507   : > { %5005 = vrcp.f32 %v3054_v44 }
 0x508   : > { %5007 = vrcp.f32 %v3045_v62 }
 0x509   : > { %5009 = vrcp.f32 %v3051_v40  ;;  %v3048_v56 = vpop.xlane.xlu0 %3047  ;;  %v3060_v57 = vpop.xlane.xlu1 %3059 }
 0x50a   : > { %5011 = vrcp.f32 %v3048_v56 }
 0x50d   : > { %v3063_v0 = vpop.xlane.xlu0 %3062 }
 0x50e   : > { %5013 = vrcp.f32 %v3063_v0 }
 0x50f   : > { %v4998_v63 = vpop.eup %4997  ;;  %5015 = vrcp.f32 %v3060_v57 }
 0x510   : > { %v5000_v45 = vpop.eup %4999  ;;  %5017 = vrcp.f32 %v3066_v55  ;;  %v3098_v49 = vmul.f32 %v4998_v63, %v5840_v1 }
 0x511   : > { %v3057_v38 = vpop.xlane.xlu0 %3056  ;;  %v5002_v33 = vpop.eup %5001  ;;  %v3095_v53 = vmul.f32 %v5000_v45, %v5820_v47 }
 0x512   : > { %5019 = vrcp.f32 %v3057_v38  ;;  %v3097_v2 = vmul.f32 %v5002_v33, %v5813_v26 }
 0x513   : > { %v5004_v24 = vpop.eup %5003 }
 0x514   : > { %v3072_v7 = vpop.xlane.xlu1 %3071  ;;  %v5006_v6 = vpop.eup %5005  ;;  %v3096_v42 = vmul.f32 %v5004_v24, %v5846_v19  ;;  %v3112_v14 = vpack.c.bf16 %v3098_v49, %v3097_v2 }
 0x515   : > { %5021 = vrcp.f32 %v3072_v7  ;;  %v5008_v61 = vpop.eup %5007  ;;  %v3102_v5 = vmul.f32 %v5006_v6, %v5833_v54 }
 0x516   : > { %v3069_v3 = vpop.xlane.xlu0 %3068  ;;  %v5010_v4 = vpop.eup %5009  ;;  %v3111_v36 = vpack.c.bf16 %v3096_v42, %v3095_v53  ;;  %v3099_v1 = vmul.f32 %v5008_v61, %v5830_v37 }
 0x517   : > { %5023 = vrcp.f32 %v3069_v3  ;;  %v5012_v16 = vpop.eup %5011  ;;  %v3101_v26 = vmul.f32 %v5010_v4, %v5825_v25 }
 0x518   : > { %v3078_v60 = vpop.xlane.xlu1 %3077  ;;  %4818 = vmatprep.mubr.msk.bf16.mxu1 %vm772_vm1, %v3111_v36  ;;  %v3100_v47 = vmul.f32 %v5012_v16, %v5852_v59 }
 0x519   : > { %5025 = vrcp.f32 %v3078_v60  ;;  %4819 = vmatmul.mubr.msk.bf16.vlgmr.msra.gmra.mxu1 %vm772_vm1, %v3112_v14  ;;  %v3114_v18 = vpack.c.bf16 %v3102_v5, %v3101_v26 }
 0x51a   : > { %v3075_v19 = vpop.xlane.xlu0 %3074  ;;  %4831 = vmatpush3.bf16.msra.mxu1 %v2665_v50  ;;  %v3113_v58 = vpack.c.bf16 %v3100_v47, %v3099_v1 }
 0x51b   : > { %5027 = vrcp.f32 %v3075_v19  ;;  %4832 = vmatprep.subr.bf16.mxu1 %v5980_v10  ;;  %v5014_v51 = vpop.eup %5013 }
 0x51c   : > { %4826 = vmatprep.mubr.msk.bf16.mxu0 %vm772_vm1, %v3113_v58  ;;  %v5016_v54 = vpop.eup %5015  ;;  %v3105_v25 = vmul.f32 %v5014_v51, %v5856_v31 }
 0x51d   : > { %4827 = vmatmul.mubr.msk.bf16.vlgmr.msra.gmra.mxu0 %vm772_vm1, %v3114_v18  ;;  %v5018_v37 = vpop.eup %5017  ;;  %v3104_v22 = vmul.f32 %v5016_v54, %v5865_v41 }
 0x51e   : > { %4833 = vmatpush3.bf16.msra.mxu1 %v5980_v10  ;;  %4839 = vmatpush3.bf16.msra.mxu0 %v5984_v21  ;;  %v3106_v8 = vmul.f32 %v5018_v37, %v5850_v17 }
 0x51f   : > { %v5020_v59 = vpop.eup %5019  ;;  %4840 = vmatprep.subr.bf16.mxu0 %v5982_v29 }
 0x520   : > { %v3103_v20 = vmul.f32 %v5020_v59, %v5886_v48  ;;  %v3116_v11 = vpack.c.bf16 %v3106_v8, %v3105_v25 }
 0x522   : > { %v5022_v35 = vpop.eup %5021  ;;  %4841 = vmatpush3.bf16.msra.mxu0 %v5982_v29  ;;  %v3115_v39 = vpack.c.bf16 %v3104_v22, %v3103_v20 }
 0x523   : > { %v3108_v50 = vmul.f32 %v5022_v35, %v5897_v15 }
 0x524   : > { %v5024_v12 = vpop.eup %5023  ;;  %4834 = vmatprep.mubr.msk.bf16.mxu1 %vm772_vm1, %v3115_v39 }
 0x525   : > { %v3107_v10 = vmul.f32 %v5024_v12, %v5907_v23  ;;  %4835 = vmatmul.mubr.msk.bf16.vlgmr.msra.gmra.mxu1 %vm772_vm1, %v3116_v11 }
 0x526   : > { %v5026_v46 = vpop.eup %5025 }
 0x527   : > { %v3117_v31 = vpack.c.bf16 %v3108_v50, %v3107_v10  ;;  %v3110_v41 = vmul.f32 %v5026_v46, %v5917_v34 }
 0x528   : > { %v5028_v48 = vpop.eup %5027 }
 0x529   : > { %4842 = vmatprep.mubr.msk.bf16.mxu0 %vm772_vm1, %v3117_v31  ;;  %v3109_v17 = vmul.f32 %v5028_v48, %v5924_v9 }
 0x52b   : > { %v3118_v29 = vpack.c.bf16 %v3110_v41, %v3109_v17 }
 0x52d   : > { %4843 = vmatmul.mubr.msk.bf16.vlgmr.msra.gmra.mxu0 %vm772_vm1, %v3118_v29 }
 0x5d9   : > { %v4820_v21 = vpop.f32.mrf.mxu1 }
 0x5db   : > { %v3159_v30 = vpop.f32.mrf.mxu1 }
 0x5dd   : > { %v4828_v40 = vpop.f32.mrf.mxu0  ;;  %v4821_v23 = vpop.f32.mrf.mxu1 }
 0x5de   : > { %v3340_v55 = vpack.c.bf16 %v4821_v23, %v4820_v21 }
 0x5df   : > { %v3214_v62 = vpop.f32.mrf.mxu0  ;;  %v3162_v28 = vpop.f32.mrf.mxu1 }
 0x5e0   : > { %v3339_v0 = vpack.c.bf16 %v3162_v28, %v3159_v30  ;;  %v3367_v63 = vshrl.u32 %v3340_v55, 16 }
 0x5e1   : > { %v4829_v15 = vpop.f32.mrf.mxu0 }
 0x5e2   : > { %v3342_v44 = vpack.c.bf16 %v4829_v15, %v4828_v40  ;;  %v3351_v38 = vshrl.u32 %v3339_v0, 16 }
 0x5e3   : > { %v3217_v13 = vpop.f32.mrf.mxu0 }
 0x5e4   : > { %v3341_v56 = vpack.c.bf16 %v3217_v13, %v3214_v62  ;;  %v3368_v9 = vshrl.u32 %v3342_v44, 16  ;;  %v3365_v33 = vpack.i.b16 %v3342_v44, %v3340_v55 }
 0x5e5   : > { %v4836_v52 = vpop.f32.mrf.mxu1 }
 0x5e6   : > { %v3352_v34 = vshrl.u32 %v3341_v56, 16  ;;  %v3369_v24 = vpack.i.b16 %v3368_v9, %v3367_v63  ;;  %v3349_v49 = vpack.i.b16 %v3341_v56, %v3339_v0  ;;  %v3511_v61 = vcombine.high %v3365_v33, %v5349_v27 }
 0x5e7   : > { %v3269_v57 = vpop.f32.mrf.mxu1  ;;  %v3518_v16 = vrot.slane %v3365_v33, %v5351_v32 }
 0x5e8   : > { %v3353_v6 = vpack.i.b16 %v3352_v34, %v3351_v38  ;;  %v3577_v3 = vcombine.high %v3369_v24, %v5349_v27  ;;  %v3379_v60 = vcombine.high %v3349_v49, %v5349_v27  ;;  %v3525_v18 = vrot.slane %v3511_v61, %v5351_v32 }
 0x5e9   : > { %v4837_v45 = vpop.f32.mrf.mxu1  ;;  %v3584_v51 = vrot.slane %v3369_v24, %v5351_v32  ;;  %v3386_v37 = vrot.slane %v3349_v49, %v5351_v32 }
 0x5ea   : > { %v3344_v53 = vpack.c.bf16 %v4837_v45, %v4836_v52  ;;  %v3445_v14 = vcombine.high %v3353_v6, %v5349_v27  ;;  %v3591_v54 = vrot.slane %v3577_v3, %v5351_v32  ;;  %v3393_v35 = vrot.slane %v3379_v60, %v5351_v32 }
 0x5eb   : > { %v3272_v2 = vpop.f32.mrf.mxu1  ;;  %v3452_v8 = vrot.slane %v3353_v6, %v5351_v32 }
 0x5ec   : > { %v3375_v5 = vshrl.u32 %v3344_v53, 16  ;;  %v3343_v47 = vpack.c.bf16 %v3272_v2, %v3269_v57  ;;  %v6030_v39 = vrot.slane %v3445_v14, %v5351_v32 }
 0x5ed   : > { %v4844_v7 = vpop.f32.mrf.mxu0 }
 0x5ee   : > { %v3359_v31 = vshrl.u32 %v3343_v47, 16 }
 0x5ef   : > { %v3324_v42 = vpop.f32.mrf.mxu0 }
 0x5f1   : > { %v4845_v4 = vpop.f32.mrf.mxu0 }
 0x5f2   : > { %v3346_v36 = vpack.c.bf16 %v4845_v4, %v4844_v7 }
 0x5f3   : > { %v3327_v1 = vpop.f32.mrf.mxu0 }
 0x5f4   : > { %v3373_v19 = vpack.i.b16 %v3346_v36, %v3344_v53  ;;  %v3376_v26 = vshrl.u32 %v3346_v36, 16  ;;  %v3345_v58 = vpack.c.bf16 %v3327_v1, %v3324_v42 }
 0x5f6   : > { %v3377_v59 = vpack.i.b16 %v3376_v26, %v3375_v5  ;;  %v3526_v25 = vcombine.high %v3373_v19, %v5349_v27  ;;  %v3533_v20 = vrot.slane %v3373_v19, %v5351_v32  ;;  %v3357_v22 = vpack.i.b16 %v3345_v58, %v3343_v47 }
 0x5f7   : > { %v3360_v12 = vshrl.u32 %v3345_v58, 16 }
 0x5f8   : > { %v3540_v11 = vrot.slane %v3526_v25, %v5351_v32  ;;  %v3541_v10 = vcombine.low %v3518_v16, %v3533_v20  ;;  %v3542_v50 = vcombine.high %v3518_v16, %v3533_v20  ;;  %v3592_v46 = vcombine.high %v3377_v59, %v5349_v27 }
 0x5f9   : > { %v3599_v48 = vrot.slane %v3377_v59, %v5351_v32  ;;  %v3394_v17 = vcombine.high %v3357_v22, %v5349_v27  ;;  %v3401_v41 = vrot.slane %v3357_v22, %v5351_v32  ;;  %v3361_v28 = vpack.i.b16 %v3360_v12, %v3359_v31 }
 0x5fa   : > { %v3549_v29 = vrot.slane %v3541_v10, %v5358_v43  ;;  %v3556_v21 = vrot.slane %v3542_v50, %v5358_v43  ;;  %v3557_v30 = vcombine.low %v3525_v18, %v3540_v11  ;;  %v3558_v40 = vcombine.high %v3525_v18, %v3540_v11 }
 0x5fb   : > { %v3606_v23 = vrot.slane %v3592_v46, %v5351_v32  ;;  %v3607_v62 = vcombine.low %v3584_v51, %v3599_v48  ;;  %v3608_v15 = vcombine.high %v3584_v51, %v3599_v48  ;;  %v3408_v55 = vrot.slane %v3394_v17, %v5351_v32 }
 0x5fc   : > { %v3565_v13 = vrot.slane %v3557_v30, %v5358_v43  ;;  %v3572_v44 = vrot.slane %v3558_v40, %v5358_v43  ;;  %v3743_v52 = vcombine.low %v3549_v29, %v3556_v21  ;;  %v4658_v63 = vcombine.high %v3549_v29, %v3556_v21 }
 0x5fd   : > { %v3615_v56 = vrot.slane %v3607_v62, %v5358_v43  ;;  %v3622_v57 = vrot.slane %v3608_v15, %v5358_v43  ;;  %v3623_v0 = vcombine.low %v3591_v54, %v3606_v23  ;;  %v3624_v9 = vcombine.high %v3591_v54, %v3606_v23 }
 0x5fe   : > { %v3759_v34 = vcombine.low %v3565_v13, %v3572_v44  ;;  %v3409_v45 = vcombine.low %v3386_v37, %v3401_v41  ;;  %v3410_v38 = vcombine.high %v3386_v37, %v3401_v41  ;;  %v4659_v7 = vcombine.high %v3565_v13, %v3572_v44 }
 0x5ff   : > { %v3631_v33 = vrot.slane %v3623_v0, %v5358_v43  ;;  %v3638_v24 = vrot.slane %v3624_v9, %v5358_v43  ;;  %v3793_v49 = vcombine.low %v3615_v56, %v3622_v57  ;;  %v3425_v42 = vcombine.low %v3393_v35, %v3408_v55 }
 0x600   : > { %v3417_v6 = vrot.slane %v3409_v45, %v5358_v43  ;;  %v3424_v53 = vrot.slane %v3410_v38, %v5358_v43  ;;  %v3426_v61 = vcombine.high %v3393_v35, %v3408_v55  ;;  %v4660_v3 = vcombine.high %v3615_v56, %v3622_v57  ;;  %v4945_v55 = vld [vmem:[%s6246_s20 + $0x8] sm:$0xff]  }
 0x601   : > { %v3460_v2 = vcombine.high %v3361_v28, %v5349_v27  ;;  %v3467_v4 = vrot.slane %v3361_v28, %v5351_v32  ;;  %v3750_v36 = vrot.slane %v3743_v52, %v5351_v32  ;;  %v3433_v16 = vrot.slane %v3425_v42, %v5358_v43  ;;  %4846 = vmatprep.subr.bf16.mxu1 %v4945_v55 }
 0x602   : > { %v3440_v60 = vrot.slane %v3426_v61, %v5358_v43  ;;  %v3643_v14 = vcombine.low %v3417_v6, %v3424_v53  ;;  %v4654_v5 = vcombine.high %v3417_v6, %v3424_v53  ;;  %v3758_v26 = vrot.slane %v4658_v63, %v5351_v32  ;;  %4847 = vmatpush3.bf16.msra.mxu1 %v4945_v55  ;;  %v4946_v53 = vld [vmem:[%s6246_s20] sm:$0xff]  }
 0x603   : > { %v3474_v1 = vrot.slane %v3460_v2, %v5351_v32  ;;  %v3475_v47 = vcombine.low %v3452_v8, %v3467_v4  ;;  %v3476_v19 = vcombine.high %v3452_v8, %v3467_v4  ;;  %v3766_v51 = vrot.slane %v3759_v34, %v5351_v32  ;;  %4848 = vmatprep.subr.bf16.mxu1 %v4946_v53 }
 0x604   : > { %v3650_v58 = vrot.slane %v3643_v14, %v5351_v32  ;;  %v3658_v27 = vrot.slane %v4654_v5, %v5351_v32  ;;  %v3659_v18 = vcombine.low %v3433_v16, %v3440_v60  ;;  %v4655_v20 = vcombine.high %v3433_v16, %v3440_v60 }
 0x605   : > { %v3483_v54 = vrot.slane %v3475_v47, %v5358_v43  ;;  %v3490_v37 = vrot.slane %v3476_v19, %v5358_v43  ;;  %v3491_v59 = vcombine.low %v6030_v39, %v3474_v1  ;;  %v3492_v25 = vcombine.high %v6030_v39, %v3474_v1 }
 0x606   : > { %v3774_v22 = vrot.slane %v4659_v7, %v5351_v32  ;;  %v3800_v35 = vrot.slane %v3793_v49, %v5351_v32  ;;  %v3808_v8 = vrot.slane %v4660_v3, %v5351_v32  ;;  %v3809_v31 = vcombine.low %v3631_v33, %v3638_v24  ;;  %4849 = vmatpush3.bf16.msra.mxu1 %v4946_v53 }
 0x607   : > { %v3499_v12 = vrot.slane %v3491_v59, %v5358_v43  ;;  %v3506_v11 = vrot.slane %v3492_v25, %v5358_v43  ;;  %v3693_v10 = vcombine.low %v3483_v54, %v3490_v37  ;;  %v4656_v50 = vcombine.high %v3483_v54, %v3490_v37 }
 0x608   : > { %v3783_v46 = vcombine.low %v3766_v51, %v3774_v22  ;;  %v4661_v48 = vcombine.high %v3631_v33, %v3638_v24  ;;  %v3775_v39 = vcombine.low %v3750_v36, %v3758_v26  ;;  %v3666_v29 = vrot.slane %v3659_v18, %v5351_v32 }
 0x609   : > { %v3709_v17 = vcombine.low %v3499_v12, %v3506_v11  ;;  %v4657_v41 = vcombine.high %v3499_v12, %v3506_v11  ;;  %v3816_v21 = vrot.slane %v3809_v31, %v5351_v32  ;;  %v3825_v40 = vcombine.low %v3800_v35, %v3808_v8 }
 0x60a   : > { %v3824_v30 = vrot.slane %v4661_v48, %v5351_v32  ;;  %v3674_v23 = vrot.slane %v4655_v20, %v5351_v32  ;;  %v3675_v62 = vcombine.low %v3650_v58, %v3658_v27  ;;  %v3700_v15 = vrot.slane %v3693_v10, %v5351_v32 }
 0x60b   : > { %v3708_v28 = vrot.slane %v4656_v50, %v5351_v32  ;;  %v3790_v13 = vrot.slane %v3783_v46, %v5358_v43  ;;  %v3716_v56 = vrot.slane %v3709_v17, %v5351_v32  ;;  %v3724_v57 = vrot.slane %v4657_v41, %v5351_v32  ;;  %v4662_v17 = vld [vmem:[%s6247_s25] ss:$0 sm:$0xff] }
 0x60c   : > { %v3833_v44 = vcombine.low %v3816_v21, %v3824_v30  ;;  %v3683_v52 = vcombine.low %v3666_v29, %v3674_v23  ;;  %v3782_v9 = vrot.slane %v3775_v39, %v5358_v43  ;;  %v3832_v63 = vrot.slane %v3825_v40, %v5358_v43  ;;  %v5045_v30 = vld [vmem:[#allocation2] sm:$0xff] }
 0x60d   : > { %v3725_v0 = vcombine.low %v3700_v15, %v3708_v28  ;;  %v3682_v38 = vrot.slane %v3675_v62, %v5358_v43  ;;  %v3733_v33 = vcombine.low %v3716_v56, %v3724_v57  ;;  %v5046_v62 = vld [vmem:[#allocation2 + $0x10] sm:$0xff]  ;;  %v5048_v56 = vld [vmem:[#allocation2 + $0x18] sm:$0xff] }
 0x60e   : > { %v3840_v34 = vrot.slane %v3833_v44, %v5358_v43  ;;  %v3690_v45 = vrot.slane %v3683_v52, %v5358_v43  ;;  %v3792_v24 = vcombine.high %v3782_v9, %v3790_v13  ;;  %v3791_v49 = vcombine.low %v3782_v9, %v3790_v13  ;;  %v5047_v52 = vld [vmem:[#allocation2 + $0x8] sm:$0xff] }
 0x60f   : > { %v3732_v42 = vrot.slane %v3725_v0, %v5358_v43  ;;  %v3740_v61 = vrot.slane %v3733_v33, %v5358_v43 }
 0x610   : > { %v3842_v7 = vcombine.high %v3832_v63, %v3840_v34  ;;  %v3841_v6 = vcombine.low %v3832_v63, %v3840_v34  ;;  %v3691_v32 = vcombine.low %v3682_v38, %v3690_v45  ;;  %v3858_v60 = vshrl.u32 %v3791_v49, 16 }
 0x611   : > { %v3741_v4 = vcombine.low %v3732_v42, %v3740_v61  ;;  %v3742_v36 = vcombine.high %v3732_v42, %v3740_v61  ;;  %v3692_v1 = vcombine.high %v3682_v38, %v3690_v45  ;;  %v3864_v54 = vshrl.u32 %v3792_v24, 16 }
 0x612   : > { %v3863_v3 = vpack.i.b16 %v3842_v7, %v3792_v24  ;;  %v3859_v2 = vshrl.u32 %v3841_v6, 16  ;;  %v3857_v16 = vpack.i.b16 %v3841_v6, %v3791_v49  ;;  %v3846_v14 = vshrl.u32 %v3691_v32, 16 }
 0x613   : > { %v3847_v5 = vshrl.u32 %v3741_v4, 16  ;;  %v3845_v19 = vpack.i.b16 %v3741_v4, %v3691_v32  ;;  %v3853_v58 = vshrl.u32 %v3742_v36, 16  ;;  %v3852_v43 = vshrl.u32 %v3692_v1, 16 }
 0x614   : > { %3873 = vrot.lane.b32.xlu1 %v3863_v3, %s5103_s23  ;;  %v3860_v47 = vpack.i.b16 %v3859_v2, %v3858_v60  ;;  %v3851_v27 = vpack.i.b16 %v3742_v36, %v3692_v1  ;;  %v3865_v18 = vshrl.u32 %v3842_v7, 16  ;;  %v4947_v1 = vld [vmem:[%s5274_s5 + $0x8] sm:$0xff]  }
 0x615   : > { %v3848_v26 = vpack.i.b16 %v3847_v5, %v3846_v14  ;;  %v3854_v51 = vpack.i.b16 %v3853_v58, %v3852_v43  ;;  %4854 = vmatprep.subr.bf16.mxu0 %v4947_v1 }
 0x616   : > { %v3866_v37 = vpack.i.b16 %v3865_v18, %v3864_v54  ;;  %4855 = vmatpush3.bf16.msra.mxu0 %v4947_v1 }
 0x617   : > { %3867 = vrot.lane.b32.xlu0 %v3848_v26, %s5104_s26 }
 0x618   : > { %3869 = vrot.lane.b32.xlu1 %v3860_v47, %s5104_s26  ;;  %v4948_v47 = vld [vmem:[%s5274_s5] sm:$0xff]  }
 0x619   : > { %4856 = vmatprep.subr.bf16.mxu0 %v4948_v47 }
 0x61a   : > { %4857 = vmatpush3.bf16.msra.mxu0 %v4948_v47 }
 0x61b   : > { %3875 = vrot.lane.b32.xlu0 %v3854_v51, %s5105_s3 }
 0x61c   : > { %3871 = vrot.lane.b32.xlu1 %v3851_v27, %s5103_s23  ;;  %s6252_s23 = sld [smem:[#allocation17_spill]] (!%p4683_p8) }
 0x620   : > { %3877 = vrot.lane.b32.xlu1 %v3866_v37, %s5105_s3 }
 0x686   : > { %v3874_v59 = vpop.permute.xlu1 %3873 }
 0x689   : > { %v3868_v20 = vpop.permute.xlu0 %3867 }
 0x68a   : > { %v3870_v25 = vpop.permute.xlu1 %3869  ;;  %v3881_v22 = vsel %vm2671_vm2, %v3845_v19, %v3868_v20 }
 0x68b   : > { %v3884_v8 = vsel %vm2671_vm2, %v3857_v16, %v3870_v25 }
 0x68c   : > { %v3889_v50 = vsel %vm3885_vm5, %v3884_v8, %v3874_v59  ;;  %v4667_v8 = vld [vmem:[%s6248_s21] ss:$0 sm:$0xff] }
 0x68d   : > { %v3876_v11 = vpop.permute.xlu0 %3875 }
 0x68e   : > { %v3872_v35 = vpop.permute.xlu1 %3871 }
 0x68f   : > { %v3887_v12 = vsel %vm3885_vm5, %v3881_v22, %v3872_v35 }
 0x690   : > { %v3892_v10 = vsel %vm3890_vm4, %v3887_v12, %v3876_v11 }
 0x691   : > { %4850 = vmatprep.mubr.msk.bf16.mxu1 %vm772_vm1, %v3892_v10 }
 0x692   : > { %v3878_v46 = vpop.permute.xlu1 %3877 }
 0x693   : > { %v3894_v31 = vsel %vm3890_vm4, %v3889_v50, %v3878_v46 }
 0x694   : > { %4851 = vmatmul.mubr.msk.bf16.vlgmr.msra.gmra.mxu1 %vm772_vm1, %v3894_v31  ;;  %v4668_v31 = vld [vmem:[%s6249_s24] ss:$0 sm:$0xff] }
 0x754   : > { %v4852_v48 = vpop.f32.mrf.mxu1 }
 0x755   : > { %v3965_v39 = vadd.f32 %v4852_v48, %v4662_v17 }
 0x756   : > { %v3956_v41 = vpop.f32.mrf.mxu1 }
 0x757   : > { %v3957_v29 = vadd.f32 %v4662_v17, %v3956_v41  ;;  %v6097_v15 = vadd.f32 %v5046_v62, %v3965_v39 }
 0x758   : > { %v4853_v21 = vpop.f32.mrf.mxu1 }
 0x759   : > { %v6095_v40 = vadd.f32 %v5045_v30, %v3957_v29  ;;  %v3968_v28 = vadd.f32 %v4853_v21, %v4662_v17  ;;  %v3983_v9 = vsel %vm772_vm1, %v6097_v15, 0.0 }
 0x75a   : > { %v3959_v23 = vpop.f32.mrf.mxu1 }
 0x75b   : > { %v3960_v13 = vadd.f32 %v4662_v17, %v3959_v23  ;;  %v3977_v44 = vsel %vm772_vm1, %v6095_v40, 0.0  ;;  %v6103_v57 = vadd.f32 %v5048_v56, %v3968_v28  ;;  %v4951_v56 = vld [vmem:[%s5284_s14 + $0x28] sm:$0xff]  }
 0x75c   : > { %3978 = vadd.xlane.f32.xlu0 %v3977_v44  ;;  %v4949_v44 = vld [vmem:[%s5284_s14 + $0x38] sm:$0xff]  }
 0x75d   : > { %v6101_v55 = vadd.f32 %v5047_v52, %v3960_v13  ;;  %v3986_v63 = vsel %vm772_vm1, %v6103_v57, 0.0  ;;  %4862 = vmatprep.subr.bf16.mxu1 %v4949_v44  ;;  %v4950_v52 = vld [vmem:[%s5284_s14 + $0x30] sm:$0xff]  }
 0x75e   : > { %4863 = vmatpush3.bf16.msra.mxu1 %v4949_v44 }
 0x75f   : > { %v3980_v0 = vsel %vm772_vm1, %v6101_v55, 0.0  ;;  %4864 = vmatprep.subr.bf16.mxu1 %v4950_v52 }
 0x760   : > { %3981 = vadd.xlane.f32.xlu1 %v3980_v0  ;;  %3984 = vadd.xlane.f32.xlu0 %v3983_v9  ;;  %v4952_v0 = vld [vmem:[%s5284_s14 + $0x20] sm:$0xff]   ;;  %v4953_v9 = vld [vmem:[%s5284_s14 + $0x18] sm:$0xff]  }
 0x762   : > { %4865 = vmatpush3.bf16.msra.mxu1 %v4950_v52 }
 0x763   : > { %4866 = vmatprep.subr.bf16.mxu1 %v4951_v56 }
 0x764   : > { %3987 = vadd.xlane.f32.xlu0 %v3986_v63  ;;  %v4954_v63 = vld [vmem:[%s5284_s14 + $0x10] sm:$0xff]  }
 0x766   : > { %4867 = vmatpush3.bf16.msra.mxu1 %v4951_v56 }
 0x767   : > { %4868 = vmatprep.subr.bf16.mxu1 %v4952_v0 }
 0x76a   : > { %4869 = vmatpush3.bf16.msra.mxu1 %v4952_v0 }
 0x76b   : > { %4870 = vmatprep.subr.bf16.mxu1 %v4953_v9 }
 0x76e   : > { %4871 = vmatpush3.bf16.msra.mxu1 %v4953_v9 }
 0x76f   : > { %4872 = vmatprep.subr.bf16.mxu1 %v4954_v63 }
 0x772   : > { %4873 = vmatpush3.bf16.msra.mxu1 %v4954_v63 }
 0x7e5   : > { %v3979_v34 = vpop.xlane.xlu0 %3978 }
 0x7e6   : > { %v3989_v45 = vmul.f32 0.03125, %v3979_v34  ;;  %v4955_v34 = vld [vmem:[%s5284_s14 + $0x8] sm:$0xff]  }
 0x7e7   : > { %4874 = vmatprep.subr.bf16.mxu1 %v4955_v34 }
 0x7e8   : > { %v3993_v38 = vsub.f32 %v6095_v40, %v3989_v45  ;;  %v4956_v45 = vld [vmem:[%s5284_s14] sm:$0xff]   ;;  %4875 = vmatpush3.bf16.msra.mxu1 %v4955_v34 }
 0x7e9   : > { %v3982_v33 = vpop.xlane.xlu1 %3981  ;;  %v3985_v24 = vpop.xlane.xlu0 %3984  ;;  %4876 = vmatprep.subr.bf16.mxu1 %v4956_v45 }
 0x7ea   : > { %v3990_v7 = vmul.f32 0.03125, %v3982_v33  ;;  %v3991_v49 = vmul.f32 0.03125, %v3985_v24  ;;  %v3997_v6 = vmul.f32 %v3993_v38, %v3993_v38 }
 0x7ec   : > { %v3994_v53 = vsub.f32 %v6101_v55, %v3990_v7  ;;  %v3995_v32 = vsub.f32 %v6097_v15, %v3991_v49  ;;  %v4001_v42 = vsel %vm772_vm1, %v3997_v6, 0.0  ;;  %4877 = vmatpush3.bf16.msra.mxu1 %v4956_v45 }
 0x7ed   : > { %4002 = vadd.xlane.f32.xlu0 %v4001_v42  ;;  %v3988_v61 = vpop.xlane.xlu0 %3987 }
 0x7ee   : > { %v3992_v3 = vmul.f32 0.03125, %v3988_v61  ;;  %v3998_v2 = vmul.f32 %v3994_v53, %v3994_v53  ;;  %v3999_v4 = vmul.f32 %v3995_v32, %v3995_v32 }
 0x7f0   : > { %v3996_v36 = vsub.f32 %v6103_v57, %v3992_v3  ;;  %v4004_v16 = vsel %vm772_vm1, %v3998_v2, 0.0  ;;  %v4007_v60 = vsel %vm772_vm1, %v3999_v4, 0.0 }
 0x7f1   : > { %4005 = vadd.xlane.f32.xlu1 %v4004_v16  ;;  %4008 = vadd.xlane.f32.xlu0 %v4007_v60 }
 0x7f2   : > { %v4000_v14 = vmul.f32 %v3996_v36, %v3996_v36 }
 0x7f4   : > { %v4010_v5 = vsel %vm772_vm1, %v4000_v14, 0.0 }
 0x7f5   : > { %4011 = vadd.xlane.f32.xlu1 %v4010_v5 }
 0x876   : > { %v4003_v19 = vpop.xlane.xlu0 %4002 }
 0x877   : > { %v4013_v26 = vmul.f32 0.03125, %v4003_v19 }
 0x879   : > { %v4017_v58 = vadd.f32 1e-05, %v4013_v26 }
 0x87a   : > { %v4006_v43 = vpop.xlane.xlu1 %4005  ;;  %v4009_v27 = vpop.xlane.xlu0 %4008 }
 0x87b   : > { %5029 = vrsqrt.f32 %v4017_v58  ;;  %v4014_v18 = vmul.f32 0.03125, %v4006_v43  ;;  %v4015_v51 = vmul.f32 0.03125, %v4009_v27 }
 0x87d   : > { %v4018_v54 = vadd.f32 1e-05, %v4014_v18  ;;  %v4019_v37 = vadd.f32 1e-05, %v4015_v51 }
 0x87e   : > { %v4012_v59 = vpop.xlane.xlu1 %4011 }
 0x87f   : > { %5031 = vrsqrt.f32 %v4018_v54  ;;  %v4016_v25 = vmul.f32 0.03125, %v4012_v59 }
 0x880   : > { %5033 = vrsqrt.f32 %v4019_v37 }
 0x881   : > { %v4020_v20 = vadd.f32 1e-05, %v4016_v25 }
 0x883   : > { %5035 = vrsqrt.f32 %v4020_v20 }
 0x888   : > { %v5030_v22 = vpop.eup %5029 }
 0x889   : > { %v4025_v35 = vmul.f32 %v5030_v22, %v3993_v38  ;;  %v4669_v38 = vld [vmem:[%s738_s6] ss:$0 sm:$0xff] }
 0x88b   : > { %v4035_v50 = vmul.f32 %v4667_v8, %v4025_v35 }
 0x88c   : > { %v5032_v12 = vpop.eup %5031 }
 0x88d   : > { %v5034_v11 = vpop.eup %5033  ;;  %v4026_v10 = vmul.f32 %v5032_v12, %v3994_v53  ;;  %v4045_v39 = vadd.f32 %v4668_v31, %v4035_v50 }
 0x88e   : > { %v4027_v46 = vmul.f32 %v5034_v11, %v3995_v32 }
 0x88f   : > { %v4036_v48 = vmul.f32 %v4667_v8, %v4026_v10 }
 0x890   : > { %v5036_v17 = vpop.eup %5035  ;;  %v4037_v21 = vmul.f32 %v4667_v8, %v4027_v46 }
 0x891   : > { %v4028_v41 = vmul.f32 %v5036_v17, %v3996_v36  ;;  %v4046_v29 = vadd.f32 %v4668_v31, %v4036_v48 }
 0x892   : > { %v4047_v62 = vadd.f32 %v4668_v31, %v4037_v21 }
 0x893   : > { %v4049_v30 = vpack.c.bf16 %v4046_v29, %v4045_v39  ;;  %v4038_v23 = vmul.f32 %v4667_v8, %v4028_v41 }
 0x895   : > { %4858 = vmatprep.mubr.msk.bf16.mxu0 %vm772_vm1, %v4049_v30  ;;  %v4048_v28 = vadd.f32 %v4668_v31, %v4038_v23  ;;  %v4674_v30 = vld [vmem:[%s746_s4] ss:$0 sm:$0xff] }
 0x897   : > { %v4050_v13 = vpack.c.bf16 %v4048_v28, %v4047_v62 }
 0x899   : > { %4859 = vmatmul.mubr.msk.bf16.vlgmr.msra.gmra.mxu0 %vm772_vm1, %v4050_v13 }
 0x959   : > { %v4860_v33 = vpop.f32.mrf.mxu0 }
 0x95a   : > { %v4123_v24 = vadd.f32 %v4860_v33, %v4669_v38 }
 0x95b   : > { %v4114_v7 = vpop.f32.mrf.mxu0 }
 0x95c   : > { %v4131_v49 = vmul.f32 %v4123_v24, %v4123_v24  ;;  %v4115_v6 = vadd.f32 %v4669_v38, %v4114_v7 }
 0x95d   : > { %v4861_v53 = vpop.f32.mrf.mxu0 }
 0x95e   : > { %v4135_v32 = vmul.f32 %v4131_v49, %v4123_v24  ;;  %v4129_v42 = vmul.f32 %v4115_v6, %v4115_v6  ;;  %v4126_v61 = vadd.f32 %v4861_v53, %v4669_v38 }
 0x95f   : > { %v4117_v3 = vpop.f32.mrf.mxu0 }
 0x960   : > { %v4139_v2 = vmul.f32 0.044715, %v4135_v32  ;;  %v4133_v4 = vmul.f32 %v4129_v42, %v4115_v6  ;;  %v4132_v36 = vmul.f32 %v4126_v61, %v4126_v61  ;;  %v4118_v16 = vadd.f32 %v4669_v38, %v4117_v3 }
 0x962   : > { %v4143_v60 = vadd.f32 %v4139_v2, %v4123_v24  ;;  %v4137_v14 = vmul.f32 0.044715, %v4133_v4  ;;  %v4136_v5 = vmul.f32 %v4132_v36, %v4126_v61  ;;  %v4130_v1 = vmul.f32 %v4118_v16, %v4118_v16 }
 0x964   : > { %v4147_v47 = vmul.f32 0.7978846, %v4143_v60  ;;  %v4141_v19 = vadd.f32 %v4137_v14, %v4115_v6  ;;  %v4140_v26 = vmul.f32 0.044715, %v4136_v5  ;;  %v4134_v58 = vmul.f32 %v4130_v1, %v4118_v16 }
 0x966   : > { %v4145_v43 = vmul.f32 0.7978846, %v4141_v19  ;;  %v4144_v27 = vadd.f32 %v4140_v26, %v4126_v61  ;;  %v4138_v18 = vmul.f32 0.044715, %v4134_v58  ;;  %5037 = vtanh.f32 %v4147_v47 }
 0x968   : > { %5039 = vtanh.f32 %v4145_v43  ;;  %v4148_v51 = vmul.f32 0.7978846, %v4144_v27  ;;  %v4142_v54 = vadd.f32 %v4138_v18, %v4118_v16 }
 0x96a   : > { %5041 = vtanh.f32 %v4148_v51  ;;  %v4146_v37 = vmul.f32 0.7978846, %v4142_v54 }
 0x96c   : > { %5043 = vtanh.f32 %v4146_v37 }
 0x973   : > { %v5038_v59 = vpop.eup %5037 }
 0x974   : > { %v4155_v35 = vadd.f32 1.0, %v5038_v59 }
 0x975   : > { %v5040_v25 = vpop.eup %5039 }
 0x976   : > { %v4153_v20 = vadd.f32 1.0, %v5040_v25  ;;  %v4159_v46 = vmul.f32 0.5, %v4155_v35 }
 0x977   : > { %v5042_v22 = vpop.eup %5041 }
 0x978   : > { %v4156_v8 = vadd.f32 1.0, %v5042_v22  ;;  %v4157_v50 = vmul.f32 0.5, %v4153_v20  ;;  %v4163_v39 = vmul.f32 %v4159_v46, %v4123_v24 }
 0x979   : > { %v5044_v12 = vpop.eup %5043 }
 0x97a   : > { %v4160_v11 = vmul.f32 0.5, %v4156_v8  ;;  %v4154_v10 = vadd.f32 1.0, %v5044_v12  ;;  %v4161_v17 = vmul.f32 %v4157_v50, %v4115_v6 }
 0x97c   : > { %v4158_v31 = vmul.f32 0.5, %v4154_v10  ;;  %v4164_v48 = vmul.f32 %v4160_v11, %v4126_v61 }
 0x97e   : > { %v4162_v41 = vmul.f32 %v4158_v31, %v4118_v16  ;;  %v4166_v21 = vpack.c.bf16 %v4164_v48, %v4163_v39 }
 0x980   : > { %v4165_v29 = vpack.c.bf16 %v4162_v41, %v4161_v17 }
 0x982   : > { %4878 = vmatprep.mubr.bf16.mxu1 %v4165_v29 }
 0x983   : > { %4879 = vmatmul.mubr.bf16.vlgmr.msra.gmra.mxu1 %v4166_v21 }
 0xa43   : > { %v4880_v23 = vpop.f32.mrf.mxu1 }
 0xa44   : > { %v4281_v62 = vadd.f32 %v4880_v23, %v4674_v30 }
 0xa45   : > { %v4272_v28 = vpop.f32.mrf.mxu1 }
 0xa46   : > { %v4289_v13 = vadd.f32 %v4281_v62, %v6097_v15  ;;  %v4273_v44 = vadd.f32 %v4674_v30, %v4272_v28 }
 0xa47   : > { %v4881_v52 = vpop.f32.mrf.mxu1 }
 0xa48   : > { %4293 = vst.msk [vmem:[#allocation2 + $0x10] sm:$0xff] %vm772_vm1, %v4289_v13  ;;  %v4287_v56 = vadd.f32 %v4273_v44, %v6095_v40  ;;  %v4284_v0 = vadd.f32 %v4881_v52, %v4674_v30 }
 0xa49   : > { %v4275_v9 = vpop.f32.mrf.mxu1 }
 0xa4a   : > { %4291 = vst.msk [vmem:[#allocation2] sm:$0xff] %vm772_vm1, %v4287_v56  ;;  %v4290_v63 = vadd.f32 %v4284_v0, %v6103_v57  ;;  %v4276_v34 = vadd.f32 %v4674_v30, %v4275_v9  ;;  %4298 = sbr.rel (%p4683_p8) target bundleno = 2956 (0xb8c), region = 92 }
 0xa4c   : > { %4294 = vst.msk [vmem:[#allocation2 + $0x18] sm:$0xff] %vm772_vm1, %v4290_v63  ;;  %v4288_v45 = vadd.f32 %v4276_v34, %v6101_v55 }
 0xa4e   : > { %4292 = vst.msk [vmem:[#allocation2 + $0x8] sm:$0xff] %vm772_vm1, %v4288_v45 }
 0xa4f   : > { %v4301_v15 = vsel %vm772_vm1, %v4287_v56, 0.0  ;;  %v4307_v40 = vsel %vm772_vm1, %v4289_v13, 0.0  ;;  %v4304_v38 = vsel %vm772_vm1, %v4288_v45, 0.0  ;;  %v4310_v57 = vsel %vm772_vm1, %v4290_v63, 0.0  ;;  %v4684_v35 = vld [vmem:[%s6251_s19] ss:$0 sm:$0xff] }
 0xa50   : > { %4302 = vadd.xlane.f32.xlu0 %v4301_v15  ;;  %4308 = vadd.xlane.f32.xlu1 %v4307_v40  ;;  %v4685_v12 = vld [vmem:[%s6252_s23] ss:$0 sm:$0xff] }
 0xa54   : > { %4305 = vadd.xlane.f32.xlu0 %v4304_v38  ;;  %4311 = vadd.xlane.f32.xlu1 %v4310_v57 }
 0xad9   : > { %v4303_v33 = vpop.xlane.xlu0 %4302  ;;  %v4309_v24 = vpop.xlane.xlu1 %4308 }
 0xada   : > { %v4313_v55 = vmul.f32 0.03125, %v4303_v33  ;;  %v4315_v7 = vmul.f32 0.03125, %v4309_v24 }
 0xadc   : > { %v4317_v49 = vsub.f32 %v4287_v56, %v4313_v55  ;;  %v4319_v6 = vsub.f32 %v4289_v13, %v4315_v7 }
 0xadd   : > { %v4306_v53 = vpop.xlane.xlu0 %4305  ;;  %v4312_v32 = vpop.xlane.xlu1 %4311 }
 0xade   : > { %v4314_v42 = vmul.f32 0.03125, %v4306_v53  ;;  %v4316_v61 = vmul.f32 0.03125, %v4312_v32  ;;  %v4321_v3 = vmul.f32 %v4317_v49, %v4317_v49  ;;  %v4323_v2 = vmul.f32 %v4319_v6, %v4319_v6 }
 0xae0   : > { %v4318_v4 = vsub.f32 %v4288_v45, %v4314_v42  ;;  %v4320_v36 = vsub.f32 %v4290_v63, %v4316_v61  ;;  %v4325_v16 = vsel %vm772_vm1, %v4321_v3, 0.0  ;;  %v4331_v60 = vsel %vm772_vm1, %v4323_v2, 0.0 }
 0xae1   : > { %4326 = vadd.xlane.f32.xlu0 %v4325_v16 }
 0xae2   : > { %v4322_v14 = vmul.f32 %v4318_v4, %v4318_v4  ;;  %v4324_v5 = vmul.f32 %v4320_v36, %v4320_v36 }
 0xae4   : > { %v4328_v1 = vsel %vm772_vm1, %v4322_v14, 0.0  ;;  %v4334_v47 = vsel %vm772_vm1, %v4324_v5, 0.0 }
 0xae5   : > { %4332 = vadd.xlane.f32.xlu0 %v4331_v60  ;;  %4329 = vadd.xlane.f32.xlu1 %v4328_v1 }
 0xae9   : > { %4335 = vadd.xlane.f32.xlu1 %v4334_v47 }
 0xb6a   : > { %v4327_v19 = vpop.xlane.xlu0 %4326 }
 0xb6b   : > { %v4337_v26 = vmul.f32 0.03125, %v4327_v19 }
 0xb6d   : > { %v4341_v58 = vadd.f32 1e-05, %v4337_v26 }
 0xb6e   : > { %v4330_v43 = vpop.xlane.xlu1 %4329  ;;  %v4333_v27 = vpop.xlane.xlu0 %4332 }
 0xb6f   : > { %5049 = vrsqrt.f32 %v4341_v58  ;;  %v4338_v18 = vmul.f32 0.03125, %v4330_v43  ;;  %v4339_v51 = vmul.f32 0.03125, %v4333_v27 }
 0xb71   : > { %v4342_v54 = vadd.f32 1e-05, %v4338_v18  ;;  %v4343_v37 = vadd.f32 1e-05, %v4339_v51 }
 0xb72   : > { %v4336_v59 = vpop.xlane.xlu1 %4335 }
 0xb73   : > { %5051 = vrsqrt.f32 %v4342_v54  ;;  %v4340_v25 = vmul.f32 0.03125, %v4336_v59 }
 0xb74   : > { %5053 = vrsqrt.f32 %v4343_v37 }
 0xb75   : > { %v4344_v20 = vadd.f32 1e-05, %v4340_v25 }
 0xb77   : > { %5055 = vrsqrt.f32 %v4344_v20 }
 0xb7c   : > { %v5050_v22 = vpop.eup %5049 }
 0xb7d   : > { %v4349_v8 = vmul.f32 %v5050_v22, %v4317_v49 }
 0xb7f   : > { %v4359_v11 = vmul.f32 %v4684_v35, %v4349_v8 }
 0xb80   : > { %v5052_v10 = vpop.eup %5051 }
 0xb81   : > { %v5054_v50 = vpop.eup %5053  ;;  %v4369_v46 = vadd.f32 %v4685_v12, %v4359_v11  ;;  %v4350_v31 = vmul.f32 %v5052_v10, %v4318_v4 }
 0xb82   : > { %v4351_v48 = vmul.f32 %v5054_v50, %v4319_v6 }
 0xb83   : > { %4373 = vst.msk [vmem:[%s5293_s0] sm:$0xff] %vm772_vm1, %v4369_v46  ;;  %v4360_v17 = vmul.f32 %v4684_v35, %v4350_v31 }
 0xb84   : > { %v5056_v41 = vpop.eup %5055  ;;  %v4361_v39 = vmul.f32 %v4684_v35, %v4351_v48 }
 0xb85   : > { %v4370_v29 = vadd.f32 %v4685_v12, %v4360_v17  ;;  %v4352_v21 = vmul.f32 %v5056_v41, %v4320_v36 }
 0xb86   : > { %v4371_v30 = vadd.f32 %v4685_v12, %v4361_v39 }
 0xb87   : > { %4374 = vst.msk [vmem:[%s5293_s0 + $0x8] sm:$0xff] %vm772_vm1, %v4370_v29  ;;  %v4362_v23 = vmul.f32 %v4684_v35, %v4352_v21 }
 0xb88   : > { %4375 = vst.msk [vmem:[%s5293_s0 + $0x10] sm:$0xff] %vm772_vm1, %v4371_v30 }
 0xb89   : > { %v4372_v62 = vadd.f32 %v4685_v12, %v4362_v23 }
 0xb8b   : > { %4376 = vst.msk [vmem:[%s5293_s0 + $0x18] sm:$0xff] %vm772_vm1, %v4372_v62 }
 0xb8c PF: > { %s6253_s26 = sld [smem:[#allocation6_spill]] }
 0xb8d   : > { %s6254_s21 = sld [smem:[#allocation4_spill]] }
 0xb8e   : > { %s6255_s22 = sld [smem:[#allocation5_spill]] }
 0xb8f   : > { %s6256_s23 = sld [smem:[#allocation7_spill]] }
 0xb90   : > { %s6257_s24 = sld [smem:[#allocation8_spill]] }
 0xb92   : > { %s26_s25 = sadd.s32 1, %s6253_s26  }
 0xb93   : > { %p23_p9 = scmp.ge.s32.totalorder %s26_s25, 6  }
 0xb95   :  { %25 = sbr.rel (!%p23_p9) target bundleno = 10 (0xa), region = 161 }

</bundles_post_ra>
